<compile_context>
chip_gen: v7x
topology: tpu7x:2x2x1
jax: 0.10.0
libtpu: 0.0.40
codegen_flags: <defaults>
</compile_context>

<pallas_src>
import jax
import jax.numpy as jnp
import numpy as np
from jax.experimental import pallas as pl
from jax.experimental.pallas import tpu as pltpu

# ---- small, module-consistent hyperparameters ----------------------------------
N_EMBD = 48          # must be divisible by N_HEAD (module default was 384)
N_HEAD = 6
HEAD_SIZE = N_EMBD // N_HEAD   # 8
SEQ_T = 16           # <= block_size; causal mask built for T inside the kernel
BATCH = 2
LN_EPS = 1e-5


def block_kernel(x_ref,
                 wqkv_ref,                        # (H, C, 3*HS) head-major fused QKV (scale folded into Q)
                 wo_ref, bo_ref,                  # (H, HS, C), (1, C)
                 w1_ref, b1_ref,                  # (C, 4C), (1, 4C)
                 w2_ref, b2_ref,                  # (4C, C), (1, C)
                 g1_ref, be1_ref, g2_ref, be2_ref,  # layernorm gains/biases (1, C)
                 o_ref):
    x = x_ref[0].astype(jnp.float32)              # (T, C)
    T, C = x.shape
    H, HS = N_HEAD, HEAD_SIZE

    # ---------------- LayerNorm 1 ----------------
    mu = jnp.mean(x, axis=-1, keepdims=True)
    var = jnp.mean((x - mu) ** 2, axis=-1, keepdims=True)
    xn1 = (x - mu) * jax.lax.rsqrt(var + LN_EPS) * g1_ref[0] + be1_ref[0]

    # ---------------- Multi-head causal self-attention (head-batched) ----------------
    # One fused, head-batched QKV projection: (H, T, C) x (H, C, 3HS) -> (H, T, 3HS)
    xb = jnp.broadcast_to(xn1[None, :, :], (H, T, C))
    qkv = jnp.einsum('htc,hcd->htd', xb, wqkv_ref[...],
                     preferred_element_type=jnp.float32)
    q = qkv[:, :, :HS]                            # (H, T, HS) -- scale already folded in
    k = qkv[:, :, HS:2 * HS]
    v = qkv[:, :, 2 * HS:]

    # Causal mask (tiny: two iotas + compare per grid step).
    row = jax.lax.broadcasted_iota(jnp.int32, (T, T), 0)
    col = jax.lax.broadcasted_iota(jnp.int32, (T, T), 1)
    causal = (row >= col)[None, :, :]             # (1, T, T) lower-triangular

    # All-head scores, single batched softmax (1 max / 1 exp / 1 sum / 1 reciprocal).
    s = jnp.einsum('hqd,hkd->hqk', q, k, preferred_element_type=jnp.float32)   # (H, T, T)
    s = jnp.where(causal, s, -1e30)               # finite large-negative, robust masking
    s = s - jnp.max(s, axis=-1, keepdims=True)
    p = jnp.exp(s)
    p = p * pl.reciprocal(jnp.sum(p, axis=-1, keepdims=True), approx=False)

    o_h = jnp.einsum('hqk,hkd->hqd', p, v, preferred_element_type=jnp.float32)  # (H, T, HS)
    # Accumulate through the output projection (no concat): sum_h o_h[h] @ Wo[h]
    sa_h = jnp.einsum('hqd,hdc->hqc', o_h, wo_ref[...],
                      preferred_element_type=jnp.float32)                       # (H, T, C)
    sa = jnp.sum(sa_h, axis=0) + bo_ref[0]

    x1 = x + sa                                                                  # residual 1

    # ---------------- LayerNorm 2 ----------------
    mu2 = jnp.mean(x1, axis=-1, keepdims=True)
    var2 = jnp.mean((x1 - mu2) ** 2, axis=-1, keepdims=True)
    xn2 = (x1 - mu2) * jax.lax.rsqrt(var2 + LN_EPS) * g2_ref[0] + be2_ref[0]

    # ---------------- FeedForward (Linear -> ReLU -> Linear) ----------------
    hid = jnp.dot(xn2, w1_ref[...], preferred_element_type=jnp.float32) + b1_ref[0]
    hid = jnp.maximum(hid, 0.0)
    ff = jnp.dot(hid, w2_ref[...], preferred_element_type=jnp.float32) + b2_ref[0]

    o_ref[0] = (x1 + ff).astype(o_ref.dtype)                                     # residual 2


def transformer_block(x, params):
    wq, wk, wv, wo, bo, w1, b1, w2, b2, g1, be1, g2, be2 = params
    B, T, C = x.shape
    H = N_HEAD
    HS = C // H
    scale = HS ** -0.5

    # Head-major fused QKV weight (H, C, 3*HS); attention scale pre-folded into the Q block.
    def per_head(w):
        return w.reshape(C, H, HS).transpose(1, 0, 2)        # (H, C, HS)

    wqkv = jnp.concatenate(
        [per_head(wq * scale), per_head(wk), per_head(wv)], axis=-1)   # (H, C, 3*HS)
    wo_h = wo.reshape(H, HS, C)                                        # (H, HS, C)

    kernel_params = (wqkv, wo_h, bo, w1, b1, w2, b2, g1, be1, g2, be2)

    def full(shape):
        return pl.BlockSpec(shape, lambda b: tuple(0 for _ in shape))

    in_specs = [pl.BlockSpec((1, T, C), lambda b: (b, 0, 0))]          # x, per-batch block
    in_specs += [full(p.shape) for p in kernel_params]                 # weights replicated
    out_spec = pl.BlockSpec((1, T, C), lambda b: (b, 0, 0))

    return pl.pallas_call(
        block_kernel,
        out_shape=jax.ShapeDtypeStruct((B, T, C), x.dtype),
        grid_spec=pltpu.PrefetchScalarGridSpec(
            num_scalar_prefetch=0,
            grid=(B,),
            in_specs=in_specs,
            out_specs=out_spec,
        ),
        compiler_params=pltpu.CompilerParams(
            dimension_semantics=("parallel",)),     # megacore-shards batch on v7x
    )(x, *kernel_params)


def init_params(key, C=N_EMBD):
    """Deterministic synthetic parameters (PyTorch Linear weights stored pre-transposed)."""
    ks = jax.random.split(key, 12)
    s = 0.05
    wq = jax.random.normal(ks[0], (C, C), jnp.float32) * s   # = concat_h(Wq_h.T)
    wk = jax.random.normal(ks[1], (C, C), jnp.float32) * s
    wv = jax.random.normal(ks[2], (C, C), jnp.float32) * s
    wo = jax.random.normal(ks[3], (C, C), jnp.float32) * s
    bo = jax.random.normal(ks[4], (1, C), jnp.float32) * s
    w1 = jax.random.normal(ks[5], (C, 4 * C), jnp.float32) * s
    b1 = jax.random.normal(ks[6], (1, 4 * C), jnp.float32) * s
    w2 = jax.random.normal(ks[7], (4 * C, C), jnp.float32) * s
    b2 = jax.random.normal(ks[8], (1, C), jnp.float32) * s
    g1 = jnp.ones((1, C), jnp.float32)
    be1 = jnp.zeros((1, C), jnp.float32)
    g2 = jnp.ones((1, C), jnp.float32)
    be2 = jnp.zeros((1, C), jnp.float32)
    return (wq, wk, wv, wo, bo, w1, b1, w2, b2, g1, be1, g2, be2)


def reference_block(x, params):
    """Pure-JAX reference matching the PyTorch Block forward (eval mode)."""
    wq, wk, wv, wo, bo, w1, b1, w2, b2, g1, be1, g2, be2 = params

    def ln(z, g, b):
        mu = jnp.mean(z, -1, keepdims=True)
        var = jnp.mean((z - mu) ** 2, -1, keepdims=True)
        return (z - mu) / jnp.sqrt(var + LN_EPS) * g + b

    B, T, C = x.shape
    xn = ln(x, g1[0], be1[0])
    q = xn @ wq
    k = xn @ wk
    v = xn @ wv
    qh = q.reshape(B, T, N_HEAD, HEAD_SIZE).transpose(0, 2, 1, 3)
    kh = k.reshape(B, T, N_HEAD, HEAD_SIZE).transpose(0, 2, 1, 3)
    vh = v.reshape(B, T, N_HEAD, HEAD_SIZE).transpose(0, 2, 1, 3)
    wei = jnp.einsum("bhqd,bhkd->bhqk", qh, kh) * HEAD_SIZE ** -0.5
    mask = jnp.tril(jnp.ones((T, T), bool))
    wei = jnp.where(mask, wei, -jnp.inf)
    wei = jax.nn.softmax(wei, axis=-1)
    out = jnp.einsum("bhqk,bhkd->bhqd", wei, vh)
    out = out.transpose(0, 2, 1, 3).reshape(B, T, C)
    sa = out @ wo + bo[0]
    x1 = x + sa
    xn2 = ln(x1, g2[0], be2[0])
    ff = jnp.maximum(xn2 @ w1 + b1[0], 0.0) @ w2 + b2[0]
    return x1 + ff


if __name__ == "__main__":
    key = jax.random.PRNGKey(0)
    kx, kp = jax.random.split(key)
    x = jax.random.normal(kx, (BATCH, SEQ_T, N_EMBD), jnp.float32)
    params = init_params(kp)

    out = transformer_block(x, params)
    out = jax.block_until_ready(out)

    ref = reference_block(x, params)
    np.testing.assert_allclose(np.asarray(out), np.asarray(ref), rtol=1e-4, atol=1e-4)
    print("KERNEL_OK")
</pallas_src>

<mosaic_0001>
module attributes {stable_mosaic.version = 11 : i64} {
  func.func @block_kernel(%arg0: i32, %arg1: memref<1x16x48xf32, #tpu.memory_space<vmem>>, %arg2: memref<6x48x24xf32, #tpu.memory_space<vmem>>, %arg3: memref<6x8x48xf32, #tpu.memory_space<vmem>>, %arg4: memref<1x48xf32, #tpu.memory_space<vmem>>, %arg5: memref<48x192xf32, #tpu.memory_space<vmem>>, %arg6: memref<1x192xf32, #tpu.memory_space<vmem>>, %arg7: memref<192x48xf32, #tpu.memory_space<vmem>>, %arg8: memref<1x48xf32, #tpu.memory_space<vmem>>, %arg9: memref<1x48xf32, #tpu.memory_space<vmem>>, %arg10: memref<1x48xf32, #tpu.memory_space<vmem>>, %arg11: memref<1x48xf32, #tpu.memory_space<vmem>>, %arg12: memref<1x48xf32, #tpu.memory_space<vmem>>, %arg13: memref<1x16x48xf32, #tpu.memory_space<vmem>>) attributes {dimension_semantics = [#tpu.dimension_semantics<parallel>], iteration_bounds = array<i64: 2>, scalar_prefetch = 0 : i64, scratch_operands = 0 : i64, tpu.core_type = #tpu.core_type<tc>, window_params = [{transform_indices = @transform_0, window_bounds = array<i64: 1, 16, 48>}, {pipeline_mode = #tpu.pipeline_mode<synchronous>, transform_indices = @transform_1, window_bounds = array<i64: 6, 48, 24>}, {pipeline_mode = #tpu.pipeline_mode<synchronous>, transform_indices = @transform_2, window_bounds = array<i64: 6, 8, 48>}, {pipeline_mode = #tpu.pipeline_mode<synchronous>, transform_indices = @transform_3, window_bounds = array<i64: 1, 48>}, {pipeline_mode = #tpu.pipeline_mode<synchronous>, transform_indices = @transform_4, window_bounds = array<i64: 48, 192>}, {pipeline_mode = #tpu.pipeline_mode<synchronous>, transform_indices = @transform_5, window_bounds = array<i64: 1, 192>}, {pipeline_mode = #tpu.pipeline_mode<synchronous>, transform_indices = @transform_6, window_bounds = array<i64: 192, 48>}, {pipeline_mode = #tpu.pipeline_mode<synchronous>, transform_indices = @transform_7, window_bounds = array<i64: 1, 48>}, {pipeline_mode = #tpu.pipeline_mode<synchronous>, transform_indices = @transform_8, window_bounds = array<i64: 1, 48>}, {pipeline_mode = #tpu.pipeline_mode<synchronous>, transform_indices = @transform_9, window_bounds = array<i64: 1, 48>}, {pipeline_mode = #tpu.pipeline_mode<synchronous>, transform_indices = @transform_10, window_bounds = array<i64: 1, 48>}, {pipeline_mode = #tpu.pipeline_mode<synchronous>, transform_indices = @transform_11, window_bounds = array<i64: 1, 48>}, {transform_indices = @transform_12, window_bounds = array<i64: 1, 16, 48>}]} {
    %c0 = arith.constant 0 : index
    %c0_0 = arith.constant 0 : index
    %c0_1 = arith.constant 0 : index
    %0 = vector.load %arg1[%c0, %c0_0, %c0_1] : memref<1x16x48xf32, #tpu.memory_space<vmem>>, vector<1x16x48xf32>
    %1 = vector.shape_cast %0 : vector<1x16x48xf32> to vector<16x48xf32>
    %cst = arith.constant dense<0.000000e+00> : vector<16xf32>
    %2 = vector.multi_reduction <add>, %1, %cst [1] : vector<16x48xf32> to vector<16xf32>
    %3 = vector.shape_cast %2 : vector<16xf32> to vector<16x1xf32>
    %cst_2 = arith.constant 4.800000e+01 : f32
    %4 = vector.broadcast %cst_2 : f32 to vector<16x1xf32>
    %5 = arith.divf %3, %4 : vector<16x1xf32>
    %6 = vector.broadcast %5 : vector<16x1xf32> to vector<16x48xf32>
    %7 = arith.subf %1, %6 : vector<16x48xf32>
    %8 = arith.mulf %7, %7 : vector<16x48xf32>
    %cst_3 = arith.constant dense<0.000000e+00> : vector<16xf32>
    %9 = vector.multi_reduction <add>, %8, %cst_3 [1] : vector<16x48xf32> to vector<16xf32>
    %10 = vector.shape_cast %9 : vector<16xf32> to vector<16x1xf32>
    %cst_4 = arith.constant 4.800000e+01 : f32
    %11 = vector.broadcast %cst_4 : f32 to vector<16x1xf32>
    %12 = arith.divf %10, %11 : vector<16x1xf32>
    %13 = vector.broadcast %5 : vector<16x1xf32> to vector<16x48xf32>
    %14 = arith.subf %1, %13 : vector<16x48xf32>
    %cst_5 = arith.constant 9.99999974E-6 : f32
    %15 = vector.broadcast %cst_5 : f32 to vector<16x1xf32>
    %16 = arith.addf %12, %15 : vector<16x1xf32>
    %17 = math.rsqrt %16 : vector<16x1xf32>
    %18 = vector.broadcast %17 : vector<16x1xf32> to vector<16x48xf32>
    %19 = arith.mulf %14, %18 : vector<16x48xf32>
    %c0_6 = arith.constant 0 : index
    %c0_7 = arith.constant 0 : index
    %20 = vector.load %arg9[%c0_6, %c0_7] : memref<1x48xf32, #tpu.memory_space<vmem>>, vector<1x48xf32>
    %21 = vector.shape_cast %20 : vector<1x48xf32> to vector<48xf32>
    %22 = vector.shape_cast %21 : vector<48xf32> to vector<1x48xf32>
    %23 = vector.broadcast %22 : vector<1x48xf32> to vector<16x48xf32>
    %24 = arith.mulf %19, %23 : vector<16x48xf32>
    %c0_8 = arith.constant 0 : index
    %c0_9 = arith.constant 0 : index
    %25 = vector.load %arg10[%c0_8, %c0_9] : memref<1x48xf32, #tpu.memory_space<vmem>>, vector<1x48xf32>
    %26 = vector.shape_cast %25 : vector<1x48xf32> to vector<48xf32>
    %27 = vector.shape_cast %26 : vector<48xf32> to vector<1x48xf32>
    %28 = vector.broadcast %27 : vector<1x48xf32> to vector<16x48xf32>
    %29 = arith.addf %24, %28 : vector<16x48xf32>
    %30 = vector.shape_cast %29 : vector<16x48xf32> to vector<1x16x48xf32>
    %31 = vector.shape_cast %30 : vector<1x16x48xf32> to vector<1x16x48xf32>
    %32 = vector.broadcast %31 : vector<1x16x48xf32> to vector<6x16x48xf32>
    %c0_10 = arith.constant 0 : index
    %c0_11 = arith.constant 0 : index
    %c0_12 = arith.constant 0 : index
    %33 = vector.load %arg2[%c0_10, %c0_11, %c0_12] : memref<6x48x24xf32, #tpu.memory_space<vmem>>, vector<6x48x24xf32>
    "tpu.trace_start"() <{level = 10 : i32, message = "htc,hcd->htd"}> : () -> ()
    %cst_13 = arith.constant dense<0.000000e+00> : vector<6x16x24xf32>
    %34 = tpu.matmul %32, %33, %cst_13 {dimension_numbers = #tpu.dot_dimension_numbers<[2], [1], [1], [2], [0, 0, 0, 1, 1, 2], [0], [0]>} : vector<6x16x48xf32>, vector<6x48x24xf32>, vector<6x16x24xf32> -> vector<6x16x24xf32>
    "tpu.trace_stop"() : () -> ()
    %35 = vector.extract_strided_slice %34 {offsets = [0, 0, 0], sizes = [6, 16, 8], strides = [1, 1, 1]} : vector<6x16x24xf32> to vector<6x16x8xf32>
    %36 = vector.extract_strided_slice %34 {offsets = [0, 0, 8], sizes = [6, 16, 8], strides = [1, 1, 1]} : vector<6x16x24xf32> to vector<6x16x8xf32>
    %37 = vector.extract_strided_slice %34 {offsets = [0, 0, 16], sizes = [6, 16, 8], strides = [1, 1, 1]} : vector<6x16x24xf32> to vector<6x16x8xf32>
    %38 = tpu.iota {dimensions = array<i32: 0>} : vector<16x16xi32>
    %39 = tpu.iota {dimensions = array<i32: 1>} : vector<16x16xi32>
    %40 = arith.cmpi sge, %38, %39 : vector<16x16xi32>
    %41 = vector.shape_cast %40 : vector<16x16xi1> to vector<1x16x16xi1>
    "tpu.trace_start"() <{level = 10 : i32, message = "hqd,hkd->hqk"}> : () -> ()
    %cst_14 = arith.constant dense<0.000000e+00> : vector<6x16x16xf32>
    %42 = tpu.matmul %35, %36, %cst_14 {dimension_numbers = #tpu.dot_dimension_numbers<[2], [2], [1], [1], [0, 0, 0, 1, 1, 1], [0], [0]>} : vector<6x16x8xf32>, vector<6x16x8xf32>, vector<6x16x16xf32> -> vector<6x16x16xf32>
    %cst_15 = arith.constant -1.000000e+30 : f32
    "tpu.trace_stop"() : () -> ()
    %43 = vector.shape_cast %41 : vector<1x16x16xi1> to vector<1x16x16xi1>
    %44 = vector.broadcast %43 : vector<1x16x16xi1> to vector<6x16x16xi1>
    %45 = vector.broadcast %cst_15 : f32 to vector<6x16x16xf32>
    %46 = arith.select %44, %42, %45 : vector<6x16x16xi1>, vector<6x16x16xf32>
    %cst_16 = arith.constant dense<0xFF800000> : vector<6x16xf32>
    %47 = vector.multi_reduction <maximumf>, %46, %cst_16 [2] : vector<6x16x16xf32> to vector<6x16xf32>
    %48 = vector.shape_cast %47 : vector<6x16xf32> to vector<6x16x1xf32>
    %49 = vector.broadcast %48 : vector<6x16x1xf32> to vector<6x16x16xf32>
    %50 = arith.subf %46, %49 : vector<6x16x16xf32>
    %51 = math.exp %50 : vector<6x16x16xf32>
    %cst_17 = arith.constant dense<0.000000e+00> : vector<6x16xf32>
    %52 = vector.multi_reduction <add>, %51, %cst_17 [2] : vector<6x16x16xf32> to vector<6x16xf32>
    %53 = vector.shape_cast %52 : vector<6x16xf32> to vector<6x16x1xf32>
    %54 = tpu.reciprocal %53 : vector<6x16x1xf32> -> vector<6x16x1xf32>
    %55 = vector.broadcast %54 : vector<6x16x1xf32> to vector<6x16x16xf32>
    %56 = arith.mulf %51, %55 : vector<6x16x16xf32>
    "tpu.trace_start"() <{level = 10 : i32, message = "hqk,hkd->hqd"}> : () -> ()
    %cst_18 = arith.constant dense<0.000000e+00> : vector<6x16x8xf32>
    %57 = tpu.matmul %56, %37, %cst_18 {dimension_numbers = #tpu.dot_dimension_numbers<[2], [1], [1], [2], [0, 0, 0, 1, 1, 2], [0], [0]>} : vector<6x16x16xf32>, vector<6x16x8xf32>, vector<6x16x8xf32> -> vector<6x16x8xf32>
    "tpu.trace_stop"() : () -> ()
    %c0_19 = arith.constant 0 : index
    %c0_20 = arith.constant 0 : index
    %c0_21 = arith.constant 0 : index
    %58 = vector.load %arg3[%c0_19, %c0_20, %c0_21] : memref<6x8x48xf32, #tpu.memory_space<vmem>>, vector<6x8x48xf32>
    "tpu.trace_start"() <{level = 10 : i32, message = "hqd,hdc->hqc"}> : () -> ()
    %cst_22 = arith.constant dense<0.000000e+00> : vector<6x16x48xf32>
    %59 = tpu.matmul %57, %58, %cst_22 {dimension_numbers = #tpu.dot_dimension_numbers<[2], [1], [1], [2], [0, 0, 0, 1, 1, 2], [0], [0]>} : vector<6x16x8xf32>, vector<6x8x48xf32>, vector<6x16x48xf32> -> vector<6x16x48xf32>
    "tpu.trace_stop"() : () -> ()
    %cst_23 = arith.constant dense<0.000000e+00> : vector<16x48xf32>
    %60 = vector.multi_reduction <add>, %59, %cst_23 [0] : vector<6x16x48xf32> to vector<16x48xf32>
    %c0_24 = arith.constant 0 : index
    %c0_25 = arith.constant 0 : index
    %61 = vector.load %arg4[%c0_24, %c0_25] : memref<1x48xf32, #tpu.memory_space<vmem>>, vector<1x48xf32>
    %62 = vector.shape_cast %61 : vector<1x48xf32> to vector<48xf32>
    %63 = vector.shape_cast %62 : vector<48xf32> to vector<1x48xf32>
    %64 = vector.broadcast %63 : vector<1x48xf32> to vector<16x48xf32>
    %65 = arith.addf %60, %64 : vector<16x48xf32>
    %66 = arith.addf %1, %65 : vector<16x48xf32>
    %cst_26 = arith.constant dense<0.000000e+00> : vector<16xf32>
    %67 = vector.multi_reduction <add>, %66, %cst_26 [1] : vector<16x48xf32> to vector<16xf32>
    %68 = vector.shape_cast %67 : vector<16xf32> to vector<16x1xf32>
    %cst_27 = arith.constant 4.800000e+01 : f32
    %69 = vector.broadcast %cst_27 : f32 to vector<16x1xf32>
    %70 = arith.divf %68, %69 : vector<16x1xf32>
    %71 = vector.broadcast %70 : vector<16x1xf32> to vector<16x48xf32>
    %72 = arith.subf %66, %71 : vector<16x48xf32>
    %73 = arith.mulf %72, %72 : vector<16x48xf32>
    %cst_28 = arith.constant dense<0.000000e+00> : vector<16xf32>
    %74 = vector.multi_reduction <add>, %73, %cst_28 [1] : vector<16x48xf32> to vector<16xf32>
    %75 = vector.shape_cast %74 : vector<16xf32> to vector<16x1xf32>
    %cst_29 = arith.constant 4.800000e+01 : f32
    %76 = vector.broadcast %cst_29 : f32 to vector<16x1xf32>
    %77 = arith.divf %75, %76 : vector<16x1xf32>
    %78 = vector.broadcast %70 : vector<16x1xf32> to vector<16x48xf32>
    %79 = arith.subf %66, %78 : vector<16x48xf32>
    %cst_30 = arith.constant 9.99999974E-6 : f32
    %80 = vector.broadcast %cst_30 : f32 to vector<16x1xf32>
    %81 = arith.addf %77, %80 : vector<16x1xf32>
    %82 = math.rsqrt %81 : vector<16x1xf32>
    %83 = vector.broadcast %82 : vector<16x1xf32> to vector<16x48xf32>
    %84 = arith.mulf %79, %83 : vector<16x48xf32>
    %c0_31 = arith.constant 0 : index
    %c0_32 = arith.constant 0 : index
    %85 = vector.load %arg11[%c0_31, %c0_32] : memref<1x48xf32, #tpu.memory_space<vmem>>, vector<1x48xf32>
    %86 = vector.shape_cast %85 : vector<1x48xf32> to vector<48xf32>
    %87 = vector.shape_cast %86 : vector<48xf32> to vector<1x48xf32>
    %88 = vector.broadcast %87 : vector<1x48xf32> to vector<16x48xf32>
    %89 = arith.mulf %84, %88 : vector<16x48xf32>
    %c0_33 = arith.constant 0 : index
    %c0_34 = arith.constant 0 : index
    %90 = vector.load %arg12[%c0_33, %c0_34] : memref<1x48xf32, #tpu.memory_space<vmem>>, vector<1x48xf32>
    %91 = vector.shape_cast %90 : vector<1x48xf32> to vector<48xf32>
    %92 = vector.shape_cast %91 : vector<48xf32> to vector<1x48xf32>
    %93 = vector.broadcast %92 : vector<1x48xf32> to vector<16x48xf32>
    %94 = arith.addf %89, %93 : vector<16x48xf32>
    %c0_35 = arith.constant 0 : index
    %c0_36 = arith.constant 0 : index
    %95 = vector.load %arg5[%c0_35, %c0_36] : memref<48x192xf32, #tpu.memory_space<vmem>>, vector<48x192xf32>
    %cst_37 = arith.constant dense<0.000000e+00> : vector<16x192xf32>
    %96 = tpu.matmul %94, %95, %cst_37 {dimension_numbers = #tpu.dot_dimension_numbers<[1], [0], [0], [1], [0, 0, 1, 1], [], []>} : vector<16x48xf32>, vector<48x192xf32>, vector<16x192xf32> -> vector<16x192xf32>
    %c0_38 = arith.constant 0 : index
    %c0_39 = arith.constant 0 : index
    %97 = vector.load %arg6[%c0_38, %c0_39] : memref<1x192xf32, #tpu.memory_space<vmem>>, vector<1x192xf32>
    %98 = vector.shape_cast %97 : vector<1x192xf32> to vector<192xf32>
    %99 = vector.shape_cast %98 : vector<192xf32> to vector<1x192xf32>
    %100 = vector.broadcast %99 : vector<1x192xf32> to vector<16x192xf32>
    %101 = arith.addf %96, %100 : vector<16x192xf32>
    %cst_40 = arith.constant 0.000000e+00 : f32
    %102 = vector.broadcast %cst_40 : f32 to vector<16x192xf32>
    %103 = arith.maximumf %101, %102 : vector<16x192xf32>
    %c0_41 = arith.constant 0 : index
    %c0_42 = arith.constant 0 : index
    %104 = vector.load %arg7[%c0_41, %c0_42] : memref<192x48xf32, #tpu.memory_space<vmem>>, vector<192x48xf32>
    %cst_43 = arith.constant dense<0.000000e+00> : vector<16x48xf32>
    %105 = tpu.matmul %103, %104, %cst_43 {dimension_numbers = #tpu.dot_dimension_numbers<[1], [0], [0], [1], [0, 0, 1, 1], [], []>} : vector<16x192xf32>, vector<192x48xf32>, vector<16x48xf32> -> vector<16x48xf32>
    %c0_44 = arith.constant 0 : index
    %c0_45 = arith.constant 0 : index
    %106 = vector.load %arg8[%c0_44, %c0_45] : memref<1x48xf32, #tpu.memory_space<vmem>>, vector<1x48xf32>
    %107 = vector.shape_cast %106 : vector<1x48xf32> to vector<48xf32>
    %108 = vector.shape_cast %107 : vector<48xf32> to vector<1x48xf32>
    %109 = vector.broadcast %108 : vector<1x48xf32> to vector<16x48xf32>
    %110 = arith.addf %105, %109 : vector<16x48xf32>
    %111 = arith.addf %66, %110 : vector<16x48xf32>
    %c0_46 = arith.constant 0 : index
    %c0_47 = arith.constant 0 : index
    %c0_48 = arith.constant 0 : index
    %112 = vector.load %arg13[%c0_46, %c0_47, %c0_48] : memref<1x16x48xf32, #tpu.memory_space<vmem>>, vector<1x16x48xf32>
    %113 = vector.shape_cast %112 : vector<1x16x48xf32> to vector<16x48xf32>
    %114 = vector.shape_cast %111 : vector<16x48xf32> to vector<1x16x48xf32>
    tpu.vector_store %arg13[%c0_46, %c0_47, %c0_48], %114 {strides = array<i32>} : memref<1x16x48xf32, #tpu.memory_space<vmem>>, vector<1x16x48xf32>,
    return
  }
  func.func @transform_0(%arg0: i32) -> (i32, i32, i32) {
    %c0_i32 = arith.constant 0 : i32
    %c0_i32_0 = arith.constant 0 : i32
    %c0_i32_1 = arith.constant 0 : i32
    return %arg0, %c0_i32, %c0_i32_0 : i32, i32, i32
  }
  func.func @transform_1(%arg0: i32) -> (i32, i32, i32) {
    %c0_i32 = arith.constant 0 : i32
    %c0_i32_0 = arith.constant 0 : i32
    %c0_i32_1 = arith.constant 0 : i32
    %c0_i32_2 = arith.constant 0 : i32
    return %c0_i32, %c0_i32_0, %c0_i32_1 : i32, i32, i32
  }
  func.func @transform_2(%arg0: i32) -> (i32, i32, i32) {
    %c0_i32 = arith.constant 0 : i32
    %c0_i32_0 = arith.constant 0 : i32
    %c0_i32_1 = arith.constant 0 : i32
    %c0_i32_2 = arith.constant 0 : i32
    return %c0_i32, %c0_i32_0, %c0_i32_1 : i32, i32, i32
  }
  func.func @transform_3(%arg0: i32) -> (i32, i32) {
    %c0_i32 = arith.constant 0 : i32
    %c0_i32_0 = arith.constant 0 : i32
    %c0_i32_1 = arith.constant 0 : i32
    return %c0_i32, %c0_i32_0 : i32, i32
  }
  func.func @transform_4(%arg0: i32) -> (i32, i32) {
    %c0_i32 = arith.constant 0 : i32
    %c0_i32_0 = arith.constant 0 : i32
    %c0_i32_1 = arith.constant 0 : i32
    return %c0_i32, %c0_i32_0 : i32, i32
  }
  func.func @transform_5(%arg0: i32) -> (i32, i32) {
    %c0_i32 = arith.constant 0 : i32
    %c0_i32_0 = arith.constant 0 : i32
    %c0_i32_1 = arith.constant 0 : i32
    return %c0_i32, %c0_i32_0 : i32, i32
  }
  func.func @transform_6(%arg0: i32) -> (i32, i32) {
    %c0_i32 = arith.constant 0 : i32
    %c0_i32_0 = arith.constant 0 : i32
    %c0_i32_1 = arith.constant 0 : i32
    return %c0_i32, %c0_i32_0 : i32, i32
  }
  func.func @transform_7(%arg0: i32) -> (i32, i32) {
    %c0_i32 = arith.constant 0 : i32
    %c0_i32_0 = arith.constant 0 : i32
    %c0_i32_1 = arith.constant 0 : i32
    return %c0_i32, %c0_i32_0 : i32, i32
  }
  func.func @transform_8(%arg0: i32) -> (i32, i32) {
    %c0_i32 = arith.constant 0 : i32
    %c0_i32_0 = arith.constant 0 : i32
    %c0_i32_1 = arith.constant 0 : i32
    return %c0_i32, %c0_i32_0 : i32, i32
  }
  func.func @transform_9(%arg0: i32) -> (i32, i32) {
    %c0_i32 = arith.constant 0 : i32
    %c0_i32_0 = arith.constant 0 : i32
    %c0_i32_1 = arith.constant 0 : i32
    return %c0_i32, %c0_i32_0 : i32, i32
  }
  func.func @transform_10(%arg0: i32) -> (i32, i32) {
    %c0_i32 = arith.constant 0 : i32
    %c0_i32_0 = arith.constant 0 : i32
    %c0_i32_1 = arith.constant 0 : i32
    return %c0_i32, %c0_i32_0 : i32, i32
  }
  func.func @transform_11(%arg0: i32) -> (i32, i32) {
    %c0_i32 = arith.constant 0 : i32
    %c0_i32_0 = arith.constant 0 : i32
    %c0_i32_1 = arith.constant 0 : i32
    return %c0_i32, %c0_i32_0 : i32, i32
  }
  func.func @transform_12(%arg0: i32) -> (i32, i32, i32) {
    %c0_i32 = arith.constant 0 : i32
    %c0_i32_0 = arith.constant 0 : i32
    %c0_i32_1 = arith.constant 0 : i32
    return %arg0, %c0_i32, %c0_i32_0 : i32, i32, i32
  }
}

</mosaic_0001>

<bundles_post_ra>
// kernel: tpu_custom_call.1
= control target key start
LH: loop header
LB: loop body
LE: loop exit
PB: predicated region body
PF: predicated region fallthrough
CT: control target
= control target key end

     0   :  { %s4587_s0 = inlined_call_operand.vmem [shape: f32[2,16,48], index: 0, kind: input, shape index: {}]   ;;  %s4588_s1 = inlined_call_operand.vmem [shape: f32[6,48,24], index: 1, kind: input, shape index: {}]   ;;  %s4589_s2 = inlined_call_operand.vmem [shape: f32[6,8,48], index: 2, kind: input, shape index: {}]   ;;  %s4590_s3 = inlined_call_operand.vmem [shape: f32[1,48], index: 3, kind: input, shape index: {}]   ;;  %s4591_s4 = inlined_call_operand.vmem [shape: f32[48,192], index: 4, kind: input, shape index: {}]   ;;  %s4592_s5 = inlined_call_operand.vmem [shape: f32[1,192], index: 5, kind: input, shape index: {}]   ;;  %s4593_s6 = inlined_call_operand.vmem [shape: f32[192,48], index: 6, kind: input, shape index: {}]   ;;  %s4594_s7 = inlined_call_operand.vmem [shape: f32[1,48], index: 7, kind: input, shape index: {}]   ;;  %s4595_s8 = inlined_call_operand.vmem [shape: f32[1,48], index: 8, kind: input, shape index: {}]   ;;  %s4596_s9 = inlined_call_operand.vmem [shape: f32[1,48], index: 9, kind: input, shape index: {}]   ;;  %s4597_s10 = inlined_call_operand.vmem [shape: f32[1,48], index: 10, kind: input, shape index: {}]   ;;  %s4598_s11 = inlined_call_operand.vmem [shape: f32[1,48], index: 11, kind: input, shape index: {}]   ;;  %s4599_s12 = inlined_call_operand.hbm [shape: f32[2,16,48], index: 12, kind: output, shape index: {}]  }
   0x1   :  { %4600 = sst [smem:[#allocation5_spill]] %s4587_s0 }
   0x2   :  { %4601 = sst [smem:[#allocation6_spill]] %s4595_s8 }
   0x3   :  { %17 = vsyncpa [#allocation3], 0 }
   0x4   :  { %19 = vsyncpa [#allocation3 + $0x1], 0  ;;  %s3919_s21 = smov 0   ;;  %s3921_s22 = smov 0  }
   0x5   :  { %s3923_s23 = smov 0   ;;  %s3925_s24 = smov 0  }
   0x6 LB: > { %s3940_s25 = sadd.s32 4294967295, %s3845_s24   ;;  %s3038_s26 = sadd.s32 4294967294, %s3845_s24   ;;  %s3845_s24 = sphi %s3925_s24, %s4615_s24   ;;  %s3841_s23 = sphi %s3923_s23, %s4614_s23   ;;  %s3837_s22 = sphi %s3921_s22, %s4613_s22   ;;  %s3833_s21 = sphi %s3919_s21, %s4612_s21  }
   0x7   : > { %s3944_s27 = sadd.s32 1, %s3845_s24   ;;  %s289_s28 = sadd.s32 1, %s3841_s23 }
   0x8   : > { %s286_s29 = ssub.s32 %s3845_s24, %s3944_s27  ;;  %p299_p0 = scmp.ne.s32.totalorder %s3841_s23, %s3837_s22 }
   0x9   : > { %p287_p1 = scmp.eq.s32.totalorder %s286_s29, 0  ;;  %p300_p2 = scmp.eq.s32.totalorder %s3940_s25, 1 }
   0xa   : > { %p305_p3 = scmp.ne.s32.totalorder %s3837_s22, %s3833_s21  ;;  %p306_p4 = scmp.eq.s32.totalorder %s3038_s26, 1 }
   0xb   : > { %s3955_s30 = scalar_select %p287_p1, %s3841_s23, %s289_s28  }
   0xc   : > { %p3957_p5 = por %p300_p2, %p299_p0  ;;  %p3961_p6 = por %p306_p4, %p305_p3 }
   0xd   : > { %p3041_p7 = scmp.ge.s32.totalorder %s3845_s24, 1  ;;  %p365_p8 = scmp.lt.s32.totalorder %s3845_s24, 3 }
   0xf   : > { %p366_p9 = pnand %p3041_p7, %p365_p8 }
  0x10   : > { %p407_p10 = scmp.lt.s32.totalorder (!%p366_p9), %s3940_s25, 1  ;;  %vm414_vm0 = vcmask (!%p366_p9), 392192   ;;  %s4604_s0 = sld [smem:[#allocation5_spill]] (!%p366_p9)  ;;  %v460_v14 = vld [vmem:[%s4588_s1] sm:$0xff] (!%p366_p9)  ;;  %v461_v15 = vld [vmem:[%s4588_s1 + $0x8] sm:$0xff] (!%p366_p9)  ;;  %v478_v16 = vld [vmem:[%s4588_s1 + $0x90] sm:$0xff] (!%p366_p9) }
  0x11   : > { %369 = sbr.rel (%p366_p9) target bundleno = 2475 (0x9ab), region = 68  ;;  %v3440_v17 = vpack.c.bf16 (!%p366_p9), %v461_v15, %v460_v14  ;;  %v479_v18 = vld [vmem:[%s4588_s1 + $0x98] sm:$0xff] (!%p366_p9)  ;;  %v462_v20 = vld [vmem:[%s4588_s1 + $0x10] sm:$0xff] (!%p366_p9)  ;;  %v480_v22 = vld [vmem:[%s4588_s1 + $0xa0] sm:$0xff] (!%p366_p9)  ;;  %s4605_s8 = sld [smem:[#allocation6_spill]] (!%p366_p9)  ;;  %vm965_vm1 = vcmask (!%p366_p9), 64512  }
  0x12   : > { %v3476_v19 = vpack.c.bf16 (!%p366_p9), %v479_v18, %v478_v16  ;;  %v463_v21 = vld [vmem:[%s4588_s1 + $0x18] sm:$0xff] (!%p366_p9)  ;;  %v481_v24 = vld [vmem:[%s4588_s1 + $0xa8] sm:$0xff] (!%p366_p9)  ;;  %v464_v26 = vld [vmem:[%s4588_s1 + $0x20] sm:$0xff] (!%p366_p9)  ;;  %s3847_s20 = smov (!%p366_p9), 120   ;;  %vm1510_vm5 = vcmask (!%p366_p9), 130048   ;;  %s3848_s26 = smov (!%p366_p9), 112  }
  0x13   : > { %3441 = vmatprep.subr.bf16.mxu0 (!%p366_p9), %v3440_v17  ;;  %v3444_v23 = vpack.c.bf16 (!%p366_p9), %v463_v21, %v462_v20  ;;  %v3480_v25 = vpack.c.bf16 (!%p366_p9), %v481_v24, %v480_v22  ;;  %v465_v27 = vld [vmem:[%s4588_s1 + $0x28] sm:$0xff] (!%p366_p9)  ;;  %v482_v28 = vld [vmem:[%s4588_s1 + $0xb0] sm:$0xff] (!%p366_p9)  ;;  %v483_v30 = vld [vmem:[%s4588_s1 + $0xb8] sm:$0xff] (!%p366_p9)  ;;  %vm2876_vm6 = vcmask (!%p366_p9), 523264   ;;  %s3121_s28 = sshll.u32 (!%p366_p9), %s3940_s25, 8  ;;  %s3851_s17 = smov (!%p366_p9), [#allocation2]  }
  0x14   : > { %3477 = vmatprep.subr.bf16.mxu1 (!%p366_p9), %v3476_v19  ;;  %3443 = vmatpush3.bf16.msra.mxu0 (!%p366_p9), %v3440_v17  ;;  %v3448_v29 = vpack.c.bf16 (!%p366_p9), %v465_v27, %v464_v26  ;;  %v3484_v31 = vpack.c.bf16 (!%p366_p9), %v483_v30, %v482_v28  ;;  %v466_v32 = vld [vmem:[%s4588_s1 + $0x30] sm:$0xff] (!%p366_p9)  ;;  %v467_v33 = vld [vmem:[%s4588_s1 + $0x38] sm:$0xff] (!%p366_p9)  ;;  %v3046_v47 = vld [vmem:[%s4596_s9] ss:$0 sm:$0xff] (!%p366_p9) }
  0x15   : > { %3479 = vmatpush3.bf16.msra.mxu1 (!%p366_p9), %v3476_v19  ;;  %3445 = vmatprep.subr.bf16.mxu0 (!%p366_p9), %v3444_v23  ;;  %v490_v34 = vld [vmem:[%s4588_s1 + $0xf0] sm:$0xff] (!%p366_p9)  ;;  %v3452_v35 = vpack.c.bf16 (!%p366_p9), %v467_v33, %v466_v32  ;;  %v491_v36 = vld [vmem:[%s4588_s1 + $0xf8] sm:$0xff] (!%p366_p9)  ;;  %v468_v52 = vld [vmem:[%s4588_s1 + $0x40] sm:$0xff] (!%p366_p9) }
  0x16   : > { %3481 = vmatprep.subr.bf16.mxu1 (!%p366_p9), %v3480_v25  ;;  %v3500_v37 = vpack.c.bf16 (!%p366_p9), %v491_v36, %v490_v34  ;;  %v469_v54 = vld [vmem:[%s4588_s1 + $0x48] sm:$0xff] (!%p366_p9)  ;;  %v492_v55 = vld [vmem:[%s4588_s1 + $0x100] sm:$0xff] (!%p366_p9)  ;;  %v470_v58 = vld [vmem:[%s4588_s1 + $0x50] sm:$0xff] (!%p366_p9) }
  0x17   : > { %v3045_v45 = vld [vmem:[%s4605_s8] ss:$0 sm:$0xff] (!%p366_p9)  ;;  %v493_v56 = vld [vmem:[%s4588_s1 + $0x108] sm:$0xff] (!%p366_p9)  ;;  %v3456_v59 = vpack.c.bf16 (!%p366_p9), %v469_v54, %v468_v52  ;;  %v471_v61 = vld [vmem:[%s4588_s1 + $0x58] sm:$0xff] (!%p366_p9)  ;;  %s404_s8 = sand.u32 (!%p366_p9), 1, %s3837_s22  }
  0x18   : > { %s408_s15 = scalar_select %p407_p10, %s3940_s25, 1  ;;  %3447 = vmatpush3.bf16.msra.mxu0 %v3444_v23  ;;  %v3504_v60 = vpack.c.bf16 %v493_v56, %v492_v55  ;;  %v494_v62 = vld [vmem:[%s4588_s1 + $0x110] sm:$0xff]  ;;  %v495_v63 = vld [vmem:[%s4588_s1 + $0x118] sm:$0xff]  ;;  %v488_v17 = vld [vmem:[%s4588_s1 + $0xe0] sm:$0xff] }
  0x19   : > { %3483 = vmatpush3.bf16.msra.mxu1 %v3480_v25  ;;  %3449 = vmatprep.subr.bf16.mxu0 %v3448_v29  ;;  %v486_v14 = vld [vmem:[%s4588_s1 + $0xd0] sm:$0xff]  ;;  %v487_v15 = vld [vmem:[%s4588_s1 + $0xd8] sm:$0xff]  ;;  %v489_v18 = vld [vmem:[%s4588_s1 + $0xe8] sm:$0xff]  ;;  %s3042_s18 = sshll.u32 %s404_s8, 4  ;;  %s4546_s25 = scalar_lea.sflag [#allocation3], %s404_s8 }
  0x1a   : > { %s3120_s16 = sshll.u32 %s408_s15, 4  ;;  %3485 = vmatprep.subr.bf16.mxu1 %v3484_v31  ;;  %v3492_v16 = vpack.c.bf16 %v487_v15, %v486_v14  ;;  %v3496_v19 = vpack.c.bf16 %v489_v18, %v488_v17  ;;  %vm4131_vm2 = vmpackc.low %vm965_vm1, %vm965_vm1 }
  0x1b   : > { %s3972_s19 = scalar_lea.vmem %s4604_s0, %s3120_s16  ;;  %s4540_s16 = scalar_lea.hbm %s4599_s12, %s3121_s28 }
  0x1c   : > { %v412_v0 = vld [vmem:[%s3972_s19] sm:$0xff]  ;;  %v413_v1 = vld [vmem:[%s3972_s19 + $0x8] sm:$0xff]  ;;  %3451 = vmatpush3.bf16.msra.mxu0 %v3448_v29  ;;  %s3787_s0 = sshll.u32 %s3851_s17, 4  ;;  %s3788_s0 = int_to_ptr.vmem [resolvable:$false] %s3787_s0 }
  0x1d   : > { %v415_v2 = vsel %vm414_vm0, %v412_v0, 0.0  ;;  %v418_v3 = vsel %vm414_vm0, %v413_v1, 0.0  ;;  %3487 = vmatpush3.bf16.msra.mxu1 %v3484_v31  ;;  %3453 = vmatprep.subr.bf16.mxu0 %v3452_v35 }
  0x1e   : > { %416 = vadd.xlane.f32.xlu0 %v415_v2  ;;  %3501 = vmatprep.subr.bf16.mxu1 %v3500_v37  ;;  %v472_v2 = vld [vmem:[%s4588_s1 + $0x60] sm:$0xff] }
  0x22   : > { %419 = vadd.xlane.f32.xlu0 %v418_v3  ;;  %v473_v3 = vld [vmem:[%s4588_s1 + $0x68] sm:$0xff] }
  0xab   : > { %v417_v4 = vpop.xlane.xlu0 %416 }
  0xac   : > { %v422_v5 = vmul.f32 0.020833334, %v417_v4  ;;  %v3464_v4 = vpack.c.bf16 %v473_v3, %v472_v2 }
  0xae   : > { %v424_v6 = vsub.f32 %v412_v0, %v422_v5  ;;  %v3460_v0 = vpack.c.bf16 %v471_v61, %v470_v58  ;;  %v474_v5 = vld [vmem:[%s4588_s1 + $0x70] sm:$0xff] }
  0xaf   : > { %v420_v7 = vpop.xlane.xlu0 %419 }
  0xb0   : > { %v423_v8 = vmul.f32 0.020833334, %v420_v7  ;;  %v426_v9 = vmul.f32 %v424_v6, %v424_v6 }
  0xb2   : > { %v425_v10 = vsub.f32 %v413_v1, %v423_v8  ;;  %v428_v11 = vsel %vm414_vm0, %v426_v9, 0.0  ;;  %v3508_v1 = vpack.c.bf16 %v495_v63, %v494_v62  ;;  %v476_v8 = vld [vmem:[%s4588_s1 + $0x80] sm:$0xff]  ;;  %v477_v9 = vld [vmem:[%s4588_s1 + $0x88] sm:$0xff]  ;;  %v952_v63 = vlaneseq }
  0xb3   : > { %429 = vadd.xlane.f32.xlu1 %v428_v11  ;;  %v484_v11 = vld [vmem:[%s4588_s1 + $0xc0] sm:$0xff] }
  0xb4   : > { %v427_v12 = vmul.f32 %v425_v10, %v425_v10  ;;  %v956_v2 = vand.u32 127, %v952_v63 }
  0xb6   : > { %v431_v13 = vsel %vm414_vm0, %v427_v12, 0.0  ;;  %v485_v12 = vld [vmem:[%s4588_s1 + $0xc8] sm:$0xff] }
  0xb7   : > { %432 = vadd.xlane.f32.xlu1 %v431_v13  ;;  %v3488_v13 = vpack.c.bf16 %v485_v12, %v484_v11 }
 0x140   : > { %v430_v38 = vpop.xlane.xlu1 %429 }
 0x141   : > { %v434_v39 = vmul.f32 0.020833334, %v430_v38 }
 0x143   : > { %v436_v40 = vadd.f32 1e-05, %v434_v39 }
 0x144   : > { %v433_v41 = vpop.xlane.xlu1 %432 }
 0x145   : > { %3725 = vrsqrt.f32 %v436_v40  ;;  %v435_v42 = vmul.f32 0.020833334, %v433_v41 }
 0x147   : > { %v437_v43 = vadd.f32 1e-05, %v435_v42 }
 0x149   : > { %3727 = vrsqrt.f32 %v437_v43 }
 0x14f   : > { %v3726_v44 = vpop.eup %3725 }
 0x150   : > { %v440_v46 = vmul.f32 %v3726_v44, %v424_v6  ;;  %v475_v6 = vld [vmem:[%s4588_s1 + $0x78] sm:$0xff] }
 0x151   : > { %v3468_v7 = vpack.c.bf16 %v475_v6, %v474_v5 }
 0x152   : > { %v449_v48 = vmul.f32 %v3045_v45, %v440_v46 }
 0x153   : > { %v3728_v49 = vpop.eup %3727 }
 0x154   : > { %v458_v50 = vadd.f32 %v3046_v47, %v449_v48  ;;  %v441_v51 = vmul.f32 %v3728_v49, %v425_v10  ;;  %v3472_v10 = vpack.c.bf16 %v477_v9, %v476_v8 }
 0x156   : > { %v450_v53 = vmul.f32 %v3045_v45, %v441_v51  ;;  %3248 = vmatprep.mubr.msk.f32.mxu0 %vm414_vm0, %v458_v50  ;;  %3293 = vmatprep.mubr.msk.f32.mxu1 %vm414_vm0, %v458_v50 }
 0x158   : > { %v459_v57 = vadd.f32 %v3046_v47, %v450_v53 }
 0x15a   : > { %3249 = vmatmul.mubr.msk.f32.vlgmr.msra.gmra.mrb[0].mxu0 %vm414_vm0, %v459_v57  ;;  %3294 = vmatmul.mubr.msk.f32.vlgmr.msra.gmra.mrb[0].mxu1 %vm414_vm0, %v459_v57 }
 0x15b   : > { %3455 = vmatpush3.bf16.msra.mxu0 %v3452_v35  ;;  %3503 = vmatpush3.bf16.msra.mxu1 %v3500_v37 }
 0x15c   : > { %3263 = vmatprep.mubr.msk.f32.mxu0 %vm414_vm0, %v458_v50  ;;  %3323 = vmatprep.mubr.msk.f32.mxu1 %vm414_vm0, %v458_v50 }
 0x15d   : > { %3457 = vmatprep.subr.bf16.mxu0 %v3456_v59  ;;  %3505 = vmatprep.subr.bf16.mxu1 %v3504_v60 }
 0x15f   : > { %3459 = vmatpush3.bf16.msra.mxu0 %v3456_v59  ;;  %3507 = vmatpush3.bf16.msra.mxu1 %v3504_v60 }
 0x160   : > { %3461 = vmatprep.subr.bf16.mxu0 %v3460_v0  ;;  %3509 = vmatprep.subr.bf16.mxu1 %v3508_v1 }
 0x163   : > { %3463 = vmatpush3.bf16.msra.mxu0 %v3460_v0  ;;  %3511 = vmatpush3.bf16.msra.mxu1 %v3508_v1  ;;  %v4170_v0 = vshrl.u32 %v952_v63, 7 }
 0x164   : > { %3465 = vmatprep.subr.bf16.mxu0 %v3464_v4 }
 0x165   : > { %v954_v1 = vadd.s32 8, %v4170_v0  ;;  %vm4178_vm4 = vcmp.ge.s32.totalorder %v4170_v0, %v956_v2 }
 0x166   : > { %3264 = vmatmul.mubr.msk.f32.vlgmr.msra.gmra.mrb[2].mxu0 %vm414_vm0, %v459_v57  ;;  %3324 = vmatmul.mubr.msk.f32.vlgmr.msra.gmra.mrb[2].mxu1 %vm414_vm0, %v459_v57 }
 0x167   : > { %3467 = vmatpush3.bf16.msra.mxu0 %v3464_v4  ;;  %3278 = vmatprep.mubr.msk.f32.mxu0 %vm414_vm0, %v458_v50  ;;  %vm4173_vm3 = vcmp.ge.s32.totalorder %v954_v1, %v956_v2 }
 0x168   : > { %3469 = vmatprep.subr.bf16.mxu0 %v3468_v7 }
 0x16b   : > { %3471 = vmatpush3.bf16.msra.mxu0 %v3468_v7 }
 0x16c   : > { %3473 = vmatprep.subr.bf16.mxu0 %v3472_v10 }
 0x16f   : > { %3475 = vmatpush3.bf16.msra.mxu0 %v3472_v10 }
 0x170   : > { %3489 = vmatprep.subr.bf16.mxu0 %v3488_v13 }
 0x172   : > { %3279 = vmatmul.mubr.msk.f32.vlgmr.msra.gmra.mrb[4].mxu0 %vm414_vm0, %v459_v57 }
 0x173   : > { %3491 = vmatpush3.bf16.msra.mxu0 %v3488_v13  ;;  %3308 = vmatprep.mubr.msk.f32.mxu0 %vm414_vm0, %v458_v50 }
 0x174   : > { %3493 = vmatprep.subr.bf16.mxu0 %v3492_v16 }
 0x177   : > { %3495 = vmatpush3.bf16.msra.mxu0 %v3492_v16 }
 0x178   : > { %3497 = vmatprep.subr.bf16.mxu0 %v3496_v19 }
 0x17b   : > { %3499 = vmatpush3.bf16.msra.mxu0 %v3496_v19 }
 0x17e   : > { %3309 = vmatmul.mubr.msk.f32.vlgmr.msra.gmra.mrb[6].mxu0 %vm414_vm0, %v459_v57 }
 0x22d   : > { %v3250_v20 = vpop.f32.mrb[0].mxu0  ;;  %v4106_v21 = vpop.f32.mrb[0].mxu1 }
 0x22e   : > { %v568_v22 = vpop.f32.mrb[1].mxu0  ;;  %v793_v23 = vpop.f32.mrb[1].mxu1 }
 0x22f   : > { %v4108_v24 = vpack.i.bf16 %v3250_v20, %v568_v22  ;;  %v4111_v25 = vpack.i.bf16 %v4106_v21, %v793_v23  ;;  %3330 = vmatprep.mubr.msk.f32.mxu0 %vm965_vm1, %v568_v22  ;;  %3351 = vmatprep.mubr.msk.f32.mxu1 %vm965_vm1, %v793_v23 }
 0x231   : > { %3666 = vrot.lane.b32.xlu0 %v4108_v24, %s3847_s20 }
 0x239   : > { %v3265_v26 = vpop.f32.mrb[2].mxu0  ;;  %v3325_v27 = vpop.f32.mrb[2].mxu1 }
 0x23a   : > { %v643_v28 = vpop.f32.mrb[3].mxu0  ;;  %v943_v29 = vpop.f32.mrb[3].mxu1 }
 0x23b   : > { %v4116_v30 = vpack.i.bf16 %v3265_v26, %v643_v28  ;;  %v4118_v31 = vpack.i.bf16 %v3325_v27, %v943_v29 }
 0x23d   : > { %3671 = vrot.lane.b32.xlu1 %v4116_v30, %s3847_s20 }
 0x245   : > { %v3280_v32 = vpop.f32.mrb[4].mxu0 }
 0x246   : > { %v718_v33 = vpop.f32.mrb[5].mxu0 }
 0x247   : > { %v4121_v34 = vpack.i.bf16 %v3280_v32, %v718_v33 }
 0x249   : > { %3676 = vrot.lane.b32.xlu1 %v4121_v34, %s3847_s20 }
 0x24d   : > { %3681 = vrot.lane.b32.xlu1 %v4111_v25, %s3847_s20 }
 0x251   : > { %3691 = vrot.lane.b32.xlu1 %v4118_v31, %s3847_s20  ;;  %v3310_v35 = vpop.f32.mrb[6].mxu0 }
 0x252   : > { %v868_v36 = vpop.f32.mrb[7].mxu0 }
 0x253   : > { %v4126_v37 = vpack.i.bf16 %v3310_v35, %v868_v36 }
 0x255   : > { %3686 = vrot.lane.b32.xlu0 %v4126_v37, %s3847_s20  ;;  %s406_s20 = scalar_lea.vmem [#allocation2], %s3042_s18  ;;  %s3789_s18 = scalar_lea.vmem %s3788_s0, 512 }
 0x2a3   : > { %v3667_v38 = vpop.permute.xlu0 %3666 }
 0x2a4   : > { %v3669_v39 = vunpack.i.h.bf16 %v3667_v38  ;;  %v3668_v40 = vunpack.i.l.bf16 %v3667_v38 }
 0x2a6   : > { %v3512_v42 = vpack.c.bf16 %v3669_v39, %v3668_v40 }
 0x2a8   : > { %3514 = vmatprep.subr.msk.bf16.mxu0 %vm4131_vm2, %v3512_v42 }
 0x2a9   : > { %3517 = vmatpush3.bf16.xpose.msk.msra.mxu0 %vm4131_vm2, %v3512_v42 }
 0x2af   : > { %v3672_v43 = vpop.permute.xlu1 %3671 }
 0x2b0   : > { %v3674_v44 = vunpack.i.h.bf16 %v3672_v43  ;;  %v3673_v45 = vunpack.i.l.bf16 %v3672_v43  ;;  %3331 = vmatmul.mubr.msk.f32.vlgmr.msra.gmra.mrb[8].mxu0 %vm965_vm1, %v3250_v20 }
 0x2b1   : > { %3337 = vmatprep.mubr.msk.f32.mxu0 %vm965_vm1, %v643_v28 }
 0x2b2   : > { %v3518_v46 = vpack.c.bf16 %v3674_v44, %v3673_v45 }
 0x2b4   : > { %3520 = vmatprep.subr.msk.bf16.mxu0 %vm4131_vm2, %v3518_v46 }
 0x2b5   : > { %3523 = vmatpush3.bf16.xpose.msk.msra.mxu0 %vm4131_vm2, %v3518_v46 }
 0x2bb   : > { %v3677_v47 = vpop.permute.xlu1 %3676 }
 0x2bc   : > { %v3679_v48 = vunpack.i.h.bf16 %v3677_v47  ;;  %v3678_v49 = vunpack.i.l.bf16 %v3677_v47  ;;  %3338 = vmatmul.mubr.msk.f32.vlgmr.msra.gmra.mrb[10].mxu0 %vm965_vm1, %v3265_v26 }
 0x2bd   : > { %3344 = vmatprep.mubr.msk.f32.mxu0 %vm965_vm1, %v718_v33 }
 0x2be   : > { %v3524_v50 = vpack.c.bf16 %v3679_v48, %v3678_v49 }
 0x2bf   : > { %v3682_v51 = vpop.permute.xlu1 %3681 }
 0x2c0   : > { %v3684_v52 = vunpack.i.h.bf16 %v3682_v51  ;;  %v3683_v53 = vunpack.i.l.bf16 %v3682_v51  ;;  %3526 = vmatprep.subr.msk.bf16.mxu0 %vm4131_vm2, %v3524_v50 }
 0x2c1   : > { %3529 = vmatpush3.bf16.xpose.msk.msra.mxu0 %vm4131_vm2, %v3524_v50 }
 0x2c2   : > { %v3530_v54 = vpack.c.bf16 %v3684_v52, %v3683_v53 }
 0x2c3   : > { %v3692_v55 = vpop.permute.xlu1 %3691 }
 0x2c4   : > { %v3694_v56 = vunpack.i.h.bf16 %v3692_v55  ;;  %v3693_v57 = vunpack.i.l.bf16 %v3692_v55  ;;  %3532 = vmatprep.subr.msk.bf16.mxu1 %vm4131_vm2, %v3530_v54 }
 0x2c5   : > { %3535 = vmatpush3.bf16.xpose.msk.msra.mxu1 %vm4131_vm2, %v3530_v54 }
 0x2c6   : > { %v3542_v58 = vpack.c.bf16 %v3694_v56, %v3693_v57 }
 0x2c7   : > { %v3687_v59 = vpop.permute.xlu0 %3686 }
 0x2c8   : > { %v3689_v60 = vunpack.i.h.bf16 %v3687_v59  ;;  %v3688_v61 = vunpack.i.l.bf16 %v3687_v59  ;;  %3345 = vmatmul.mubr.msk.f32.vlgmr.msra.gmra.mrb[12].mxu0 %vm965_vm1, %v3280_v32  ;;  %3544 = vmatprep.subr.msk.bf16.mxu1 %vm4131_vm2, %v3542_v58 }
 0x2c9   : > { %3358 = vmatprep.mubr.msk.f32.mxu0 %vm965_vm1, %v868_v36 }
 0x2ca   : > { %v3536_v62 = vpack.c.bf16 %v3689_v60, %v3688_v61 }
 0x2cc   : > { %3352 = vmatmul.mubr.msk.f32.vlgmr.msra.gmra.mrb[4].mxu1 %vm965_vm1, %v4106_v21  ;;  %3538 = vmatprep.subr.msk.bf16.mxu0 %vm4131_vm2, %v3536_v62 }
 0x2cd   : > { %3541 = vmatpush3.bf16.xpose.msk.msra.mxu0 %vm4131_vm2, %v3536_v62  ;;  %3547 = vmatpush3.bf16.xpose.msk.msra.mxu1 %vm4131_vm2, %v3542_v58 }
 0x2ce   : > { %3365 = vmatprep.mubr.msk.f32.mxu1 %vm965_vm1, %v943_v29 }
 0x2d4   : > { %3359 = vmatmul.mubr.msk.f32.vlgmr.msra.gmra.mrb[14].mxu0 %vm965_vm1, %v3310_v35  ;;  %3366 = vmatmul.mubr.msk.f32.vlgmr.msra.gmra.mrb[6].mxu1 %vm965_vm1, %v3325_v27 }
 0x383   : > { %v3332_v5 = vpop.f32.mrb[8].mxu0 }
 0x384   : > { %v1499_v6 = vsel %vm4173_vm3, %v3332_v5, -1e+30  ;;  %v1040_v7 = vpop.f32.mrb[9].mxu0 }
 0x385   : > { %v1498_v8 = vsel %vm4178_vm4, %v1040_v7, -1e+30  ;;  %v1514_v9 = vsel %vm1510_vm5, %v1499_v6, -inf }
 0x386   : > { %1515 = vmax.xlane.f32.xlu1 %v1514_v9  ;;  %v1511_v10 = vsel %vm1510_vm5, %v1498_v8, -inf }
 0x387   : > { %1512 = vmax.xlane.f32.xlu0 %v1511_v10 }
 0x38f   : > { %v3339_v11 = vpop.f32.mrb[10].mxu0 }
 0x390   : > { %v1129_v12 = vpop.f32.mrb[11].mxu0  ;;  %v1501_v22 = vsel %vm4173_vm3, %v3339_v11, -1e+30 }
 0x391   : > { %v1520_v26 = vsel %vm1510_vm5, %v1501_v22, -inf  ;;  %v1500_v27 = vsel %vm4178_vm4, %v1129_v12, -1e+30 }
 0x392   : > { %v1517_v39 = vsel %vm1510_vm5, %v1500_v27, -inf }
 0x39b   : > { %v3346_v13 = vpop.f32.mrb[12].mxu0 }
 0x39c   : > { %v1218_v14 = vpop.f32.mrb[13].mxu0  ;;  %v4195_v20 = vsel %vm4173_vm3, %v3346_v13, -1e+30 }
 0x39d   : > { %v1526_v23 = vsel %vm1510_vm5, %v4195_v20, -inf  ;;  %v4216_v40 = vsel %vm4178_vm4, %v1218_v14, -1e+30 }
 0x39e   : > { %v1523_v42 = vsel %vm1510_vm5, %v4216_v40, -inf }
 0x39f   : > { %v3353_v15 = vpop.f32.mrb[4].mxu1 }
 0x3a0   : > { %v1505_v16 = vsel %vm4173_vm3, %v3353_v15, -1e+30  ;;  %v1307_v17 = vpop.f32.mrb[5].mxu1 }
 0x3a1   : > { %v1504_v18 = vsel %vm4178_vm4, %v1307_v17, -1e+30  ;;  %v1532_v19 = vsel %vm1510_vm5, %v1505_v16, -inf }
 0x3a2   : > { %1533 = vmax.xlane.f32.xlu1 %v1532_v19  ;;  %v1529_v21 = vsel %vm1510_vm5, %v1504_v18, -inf }
 0x3a3   : > { %1530 = vmax.xlane.f32.xlu0 %v1529_v21 }
 0x3a6   : > { %1527 = vmax.xlane.f32.xlu1 %v1526_v23 }
 0x3a7   : > { %v3367_v28 = vpop.f32.mrb[6].mxu1  ;;  %1521 = vmax.xlane.f32.xlu0 %v1520_v26  ;;  %v3360_v29 = vpop.f32.mrb[14].mxu0 }
 0x3a8   : > { %v4207_v32 = vsel %vm4173_vm3, %v3360_v29, -1e+30  ;;  %v1396_v33 = vpop.f32.mrb[15].mxu0  ;;  %v1485_v35 = vpop.f32.mrb[7].mxu1  ;;  %v1509_v38 = vsel %vm4173_vm3, %v3367_v28, -1e+30 }
 0x3a9   : > { %v1538_v36 = vsel %vm1510_vm5, %v4207_v32, -inf  ;;  %v1544_v41 = vsel %vm1510_vm5, %v1509_v38, -inf  ;;  %v4223_v43 = vsel %vm4178_vm4, %v1396_v33, -1e+30  ;;  %v4229_v45 = vsel %vm4178_vm4, %v1485_v35, -1e+30 }
 0x3aa   : > { %1539 = vmax.xlane.f32.xlu1 %v1538_v36  ;;  %v1535_v44 = vsel %vm1510_vm5, %v4223_v43, -inf  ;;  %v1541_v46 = vsel %vm1510_vm5, %v4229_v45, -inf }
 0x3ab   : > { %1518 = vmax.xlane.f32.xlu0 %v1517_v39 }
 0x3ae   : > { %1545 = vmax.xlane.f32.xlu1 %v1544_v41 }
 0x3af   : > { %1524 = vmax.xlane.f32.xlu0 %v1523_v42 }
 0x3b3   : > { %1536 = vmax.xlane.f32.xlu0 %v1535_v44 }
 0x3b7   : > { %1542 = vmax.xlane.f32.xlu0 %v1541_v46 }
 0x3bf   : > { %3701 = vrot.lane.b32.xlu1 %v4116_v30, %s3848_s26 }
 0x3c3   : > { %3706 = vrot.lane.b32.xlu1 %v4121_v34, %s3848_s26 }
 0x3c7   : > { %3711 = vrot.lane.b32.xlu1 %v4111_v25, %s3848_s26 }
 0x3cd   : > { %3696 = vrot.lane.b32.xlu0 %v4108_v24, %s3848_s26 }
 0x413   : > { %v1516_v47 = vpop.xlane.xlu1 %1515 }
 0x414   : > { %v1548_v48 = vsub.f32 %v1499_v6, %v1516_v47  ;;  %v1513_v49 = vpop.xlane.xlu0 %1512 }
 0x415   : > { %v1547_v50 = vsub.f32 %v1498_v8, %v1513_v49 }
 0x416   : > { %v1561_v51 = vmul.f32 1.442695, %v1548_v48 }
 0x417   : > { %v1559_v52 = vmul.f32 1.442695, %v1547_v50 }
 0x418   : > { %3729 = vpow2.f32 %v1561_v51 }
 0x419   : > { %3731 = vpow2.f32 %v1559_v52 }
 0x422   : > { %v4241_v53 = vpop.eup %3729 }
 0x423   : > { %v4243_v30 = vpop.eup %3731  ;;  %v1586_v34 = vsel %vm1510_vm5, %v4241_v53, 0.0 }
 0x424   : > { %1587 = vadd.xlane.f32.xlu1 %v1586_v34  ;;  %v1583_v25 = vsel %vm1510_vm5, %v4243_v30, 0.0 }
 0x425   : > { %1584 = vadd.xlane.f32.xlu0 %v1583_v25 }
 0x42f   : > { %v1534_v24 = vpop.xlane.xlu1 %1533 }
 0x430   : > { %v1554_v54 = vsub.f32 %v1505_v16, %v1534_v24  ;;  %v1531_v55 = vpop.xlane.xlu0 %1530 }
 0x431   : > { %v1553_v56 = vsub.f32 %v1504_v18, %v1531_v55 }
 0x432   : > { %v1573_v57 = vmul.f32 1.442695, %v1554_v54 }
 0x433   : > { %v1571_v58 = vmul.f32 1.442695, %v1553_v56  ;;  %v1528_v59 = vpop.xlane.xlu1 %1527 }
 0x434   : > { %3733 = vpow2.f32 %v1573_v57  ;;  %v1522_v60 = vpop.xlane.xlu0 %1521  ;;  %v1552_v3 = vsub.f32 %v4195_v20, %v1528_v59 }
 0x435   : > { %3735 = vpow2.f32 %v1571_v58  ;;  %v1550_v61 = vsub.f32 %v1501_v22, %v1522_v60 }
 0x436   : > { %v1569_v9 = vmul.f32 1.442695, %v1552_v3 }
 0x437   : > { %v1565_v62 = vmul.f32 1.442695, %v1550_v61  ;;  %v1540_v63 = vpop.xlane.xlu1 %1539 }
 0x438   : > { %v1519_v1 = vpop.xlane.xlu0 %1518  ;;  %v1556_v10 = vsub.f32 %v4207_v32, %v1540_v63 }
 0x439   : > { %3737 = vpow2.f32 %v1565_v62  ;;  %v1549_v2 = vsub.f32 %v1500_v27, %v1519_v1 }
 0x43a   : > { %v1577_v19 = vmul.f32 1.442695, %v1556_v10 }
 0x43b   : > { %v1563_v4 = vmul.f32 1.442695, %v1549_v2  ;;  %v1546_v5 = vpop.xlane.xlu1 %1545 }
 0x43c   : > { %v1558_v6 = vsub.f32 %v1509_v38, %v1546_v5  ;;  %v1525_v7 = vpop.xlane.xlu0 %1524 }
 0x43d   : > { %3739 = vpow2.f32 %v1563_v4  ;;  %v1551_v22 = vsub.f32 %v4216_v40, %v1525_v7 }
 0x43e   : > { %v4250_v8 = vpop.eup %3733  ;;  %v1581_v11 = vmul.f32 1.442695, %v1558_v6 }
 0x43f   : > { %v4253_v12 = vpop.eup %3735  ;;  %v3702_v13 = vpop.permute.xlu1 %3701  ;;  %v1604_v14 = vsel %vm1510_vm5, %v4250_v8, 0.0  ;;  %v1567_v32 = vmul.f32 1.442695, %v1551_v22 }
 0x440   : > { %3741 = vpow2.f32 %v1581_v11  ;;  %v3704_v15 = vunpack.i.h.bf16 %v3702_v13  ;;  %v3703_v16 = vunpack.i.l.bf16 %v3702_v13  ;;  %1605 = vadd.xlane.f32.xlu1 %v1604_v14  ;;  %v1537_v17 = vpop.xlane.xlu0 %1536  ;;  %v1601_v18 = vsel %vm1510_vm5, %v4253_v12, 0.0 }
 0x441   : > { %1602 = vadd.xlane.f32.xlu0 %v1601_v18  ;;  %3743 = vpow2.f32 %v1569_v9  ;;  %v1555_v33 = vsub.f32 %v4223_v43, %v1537_v17 }
 0x442   : > { %v3552_v20 = vpack.c.bf16 %v3704_v15, %v3703_v16  ;;  %3745 = vpow2.f32 %v1577_v19 }
 0x443   : > { %v4259_v21 = vpop.eup %3737  ;;  %v3707_v23 = vpop.permute.xlu1 %3706  ;;  %v1575_v43 = vmul.f32 1.442695, %v1555_v33 }
 0x444   : > { %3553 = vmatprep.subr.bf16.mxu1 %v3552_v20  ;;  %v1543_v26 = vpop.xlane.xlu0 %1542  ;;  %v1592_v27 = vsel %vm1510_vm5, %v4259_v21, 0.0  ;;  %v3709_v38 = vunpack.i.h.bf16 %v3707_v23  ;;  %v3708_v44 = vunpack.i.l.bf16 %v3707_v23 }
 0x445   : > { %v1557_v28 = vsub.f32 %v4229_v45, %v1543_v26  ;;  %1593 = vadd.xlane.f32.xlu1 %v1592_v27  ;;  %3555 = vmatpush3.bf16.msra.mxu1 %v3552_v20 }
 0x446   : > { %v3556_v52 = vpack.c.bf16 %v3709_v38, %v3708_v44  ;;  %v2165_v44 = vld [vmem:[%s4589_s2] sm:$0xff] }
 0x447   : > { %v4265_v29 = vpop.eup %3739  ;;  %v1579_v35 = vmul.f32 1.442695, %v1557_v28  ;;  %v3712_v36 = vpop.permute.xlu1 %3711 }
 0x448   : > { %v3714_v39 = vunpack.i.h.bf16 %v3712_v36  ;;  %v3713_v40 = vunpack.i.l.bf16 %v3712_v36  ;;  %v3697_v41 = vpop.permute.xlu0 %3696  ;;  %v1589_v42 = vsel %vm1510_vm5, %v4265_v29, 0.0 }
 0x449   : > { %3747 = vpow2.f32 %v1579_v35  ;;  %v3699_v45 = vunpack.i.h.bf16 %v3697_v41  ;;  %v3698_v46 = vunpack.i.l.bf16 %v3697_v41  ;;  %1590 = vadd.xlane.f32.xlu0 %v1589_v42 }
 0x44a   : > { %v4270_v47 = vpop.eup %3741  ;;  %v4272_v48 = vpack.c.bf16 %v3714_v39, %v3713_v40  ;;  %3749 = vpow2.f32 %v1567_v32 }
 0x44b   : > { %v3548_v49 = vpack.c.bf16 %v3699_v45, %v3698_v46  ;;  %v1616_v50 = vsel %vm1510_vm5, %v4270_v47, 0.0  ;;  %v4276_v51 = vpop.eup %3743  ;;  %3751 = vpow2.f32 %v1575_v43  ;;  %v2166_v45 = vld [vmem:[%s4589_s2 + $0x8] sm:$0xff]  ;;  %v2168_v46 = vld [vmem:[%s4589_s2 + $0x18] sm:$0xff] }
 0x44c   : > { %1617 = vadd.xlane.f32.xlu1 %v1616_v50  ;;  %3561 = vmatprep.subr.bf16.mxu1 %v4272_v48  ;;  %v1598_v34 = vsel %vm1510_vm5, %v4276_v51, 0.0  ;;  %v4281_v25 = vpop.eup %3745 }
 0x44d   : > { %3549 = vmatprep.subr.bf16.mxu0 %v3548_v49  ;;  %v1610_v54 = vsel %vm1510_vm5, %v4281_v25, 0.0 }
 0x44e   : > { %3551 = vmatpush3.bf16.msra.mxu0 %v3548_v49  ;;  %v2169_v49 = vld [vmem:[%s4589_s2 + $0x20] sm:$0xff] }
 0x44f   : > { %3557 = vmatprep.subr.bf16.mxu0 %v3556_v52 }
 0x450   : > { %1599 = vadd.xlane.f32.xlu1 %v1598_v34 }
 0x453   : > { %v4283_v24 = vpop.eup %3747 }
 0x454   : > { %1611 = vadd.xlane.f32.xlu1 %v1610_v54  ;;  %v1613_v55 = vsel %vm1510_vm5, %v4283_v24, 0.0  ;;  %v4289_v56 = vpop.eup %3749 }
 0x455   : > { %1614 = vadd.xlane.f32.xlu0 %v1613_v55  ;;  %v1595_v57 = vsel %vm1510_vm5, %v4289_v56, 0.0  ;;  %v4293_v58 = vpop.eup %3751 }
 0x456   : > { %v1607_v59 = vsel %vm1510_vm5, %v4293_v58, 0.0 }
 0x459   : > { %1596 = vadd.xlane.f32.xlu0 %v1595_v57 }
 0x45d   : > { %1608 = vadd.xlane.f32.xlu0 %v1607_v59 }
 0x465   : > { %3721 = vrot.lane.b32.xlu1 %v4118_v31, %s3848_s26 }
 0x473   : > { %3716 = vrot.lane.b32.xlu0 %v4126_v37, %s3848_s26  ;;  %s2976_s26 = sshll.u32 %s406_s20, 4  ;;  %s4542_s26 = int_to_ptr.vmem [resolvable:$true] %s2976_s26 }
 0x474   : > { %p3790_p0 = scmp.lt.s32.totalorder %s4542_s26, %s3788_s0 }
 0x4b1   : > { %v1588_v60 = vpop.xlane.xlu1 %1587 }
 0x4b2   : > { %3753 = vrcp.f32 %v1588_v60  ;;  %v1585_v61 = vpop.xlane.xlu0 %1584 }
 0x4b3   : > { %3755 = vrcp.f32 %v1585_v61 }
 0x4bc   : > { %v3754_v62 = vpop.eup %3753 }
 0x4bd   : > { %v3756_v63 = vpop.eup %3755  ;;  %v1632_v2 = vmul.f32 %v3754_v62, %v4241_v53 }
 0x4be   : > { %v1631_v1 = vmul.f32 %v3756_v63, %v4243_v30 }
 0x4c0   : > { %3372 = vmatprep.mubr.msk.f32.mxu0 %vm1510_vm5, %v1631_v1 }
 0x4c1   : > { %3373 = vmatmul.mubr.msk.f32.vlgmr.msra.gmra.mrb[16].mxu0 %vm1510_vm5, %v1632_v2 }
 0x4c2   : > { %3559 = vmatpush3.bf16.msra.mxu0 %v3556_v52  ;;  %v2170_v52 = vld [vmem:[%s4589_s2 + $0x28] sm:$0xff] }
 0x4cd   : > { %v1606_v3 = vpop.xlane.xlu1 %1605 }
 0x4ce   : > { %v1603_v31 = vpop.xlane.xlu0 %1602 }
 0x4cf   : > { %3757 = vrcp.f32 %v1603_v31 }
 0x4d2   : > { %v1594_v4 = vpop.xlane.xlu1 %1593 }
 0x4d3   : > { %3759 = vrcp.f32 %v1594_v4 }
 0x4d6   : > { %v1591_v37 = vpop.xlane.xlu0 %1590 }
 0x4d7   : > { %3761 = vrcp.f32 %v1591_v37 }
 0x4d8   : > { %3763 = vrcp.f32 %v1606_v3 }
 0x4d9   : > { %v1618_v5 = vpop.xlane.xlu1 %1617  ;;  %v3758_v7 = vpop.eup %3757 }
 0x4da   : > { %3765 = vrcp.f32 %v1618_v5  ;;  %v1637_v15 = vmul.f32 %v3758_v7, %v4253_v12 }
 0x4dd   : > { %v1600_v6 = vpop.xlane.xlu1 %1599  ;;  %v3760_v9 = vpop.eup %3759 }
 0x4de   : > { %v1634_v13 = vmul.f32 %v3760_v9, %v4259_v21 }
 0x4e1   : > { %v3762_v30 = vpop.eup %3761  ;;  %v1612_v10 = vpop.xlane.xlu1 %1611 }
 0x4e2   : > { %v1615_v53 = vpop.xlane.xlu0 %1614  ;;  %v1633_v11 = vmul.f32 %v3762_v30, %v4265_v29  ;;  %v3764_v14 = vpop.eup %3763 }
 0x4e3   : > { %3767 = vrcp.f32 %v1615_v53  ;;  %v1638_v20 = vmul.f32 %v3764_v14, %v4250_v8 }
 0x4e4   : > { %3379 = vmatprep.mubr.msk.f32.mxu1 %vm1510_vm5, %v1633_v11  ;;  %3769 = vrcp.f32 %v1600_v6  ;;  %v3766_v22 = vpop.eup %3765 }
 0x4e5   : > { %v3722_v16 = vpop.permute.xlu1 %3721  ;;  %3380 = vmatmul.mubr.msk.f32.vlgmr.msra.gmra.mrb[8].mxu1 %vm1510_vm5, %v1634_v13  ;;  %v1642_v28 = vmul.f32 %v3766_v22, %v4270_v47  ;;  %v2167_v47 = vld [vmem:[%s4589_s2 + $0x10] sm:$0xff] }
 0x4e6   : > { %v3724_v17 = vunpack.i.h.bf16 %v3722_v16  ;;  %v3723_v18 = vunpack.i.l.bf16 %v3722_v16  ;;  %3563 = vmatpush3.bf16.msra.mxu1 %v4272_v48  ;;  %3393 = vmatprep.mubr.msk.f32.mxu1 %vm1510_vm5, %v1637_v15  ;;  %v1597_v19 = vpop.xlane.xlu0 %1596 }
 0x4e7   : > { %3771 = vrcp.f32 %v1597_v19 }
 0x4e8   : > { %v3568_v21 = vpack.c.bf16 %v3724_v17, %v3723_v18  ;;  %3773 = vrcp.f32 %v1612_v10 }
 0x4e9   : > { %3394 = vmatmul.mubr.msk.f32.vlgmr.msra.gmra.mrb[10].mxu1 %vm1510_vm5, %v1638_v20 }
 0x4ea   : > { %3569 = vmatprep.subr.bf16.mxu1 %v3568_v21  ;;  %v1609_v12 = vpop.xlane.xlu0 %1608 }
 0x4eb   : > { %3775 = vrcp.f32 %v1609_v12  ;;  %3571 = vmatpush3.bf16.msra.mxu1 %v3568_v21 }
 0x4ec   : > { %3415 = vmatprep.subr.mxu1 %v2166_v45 }
 0x4ed   : > { %v3768_v23 = vpop.eup %3767 }
 0x4ee   : > { %v3717_v26 = vpop.permute.xlu0 %3716  ;;  %v1641_v27 = vmul.f32 %v3768_v23, %v4283_v24  ;;  %v3770_v33 = vpop.eup %3769  ;;  %v3107_v23 = vld [vmem:[%s4590_s3] ss:$0 sm:$0xff] }
 0x4ef   : > { %v3719_v29 = vunpack.i.h.bf16 %v3717_v26  ;;  %v3718_v32 = vunpack.i.l.bf16 %v3717_v26  ;;  %v1636_v38 = vmul.f32 %v3770_v33, %v4276_v51 }
 0x4f0   : > { %3407 = vmatprep.mubr.msk.f32.mxu1 %vm1510_vm5, %v1641_v27 }
 0x4f1   : > { %v3772_v8 = vpop.eup %3771  ;;  %v3564_v35 = vpack.c.bf16 %v3719_v29, %v3718_v32  ;;  %3408 = vmatmul.mubr.msk.f32.vlgmr.msra.gmra.mrb[12].mxu1 %vm1510_vm5, %v1642_v28 }
 0x4f2   : > { %v1635_v36 = vmul.f32 %v3772_v8, %v4289_v56  ;;  %v3774_v39 = vpop.eup %3773  ;;  %3416 = vmatpush3.msra.mxu1 %v2166_v45  ;;  %v3781_v8 = vld [vmem:[%s3972_s19 + $0x8] sm:$0xff] }
 0x4f3   : > { %3565 = vmatprep.subr.bf16.mxu0 %v3564_v35  ;;  %v1640_v42 = vmul.f32 %v3774_v39, %v4281_v25  ;;  %3425 = vmatprep.subr.mxu1 %v2168_v46 }
 0x4f4   : > { %3386 = vmatprep.mubr.msk.f32.mxu0 %vm1510_vm5, %v1635_v36  ;;  %v3782_v36 = vld [vmem:[%s3972_s19] sm:$0xff]  ;;  %s3783_s19 = scalar_lea.vmem %s4542_s26, 256 }
 0x4f5   : > { %v3776_v40 = vpop.eup %3775  ;;  %3387 = vmatmul.mubr.msk.f32.vlgmr.msra.gmra.mrb[18].mxu0 %vm1510_vm5, %v1636_v38  ;;  %p3784_p11 = scmp.ne.s32.totalorder %s4542_s26, %s3783_s19  ;;  %p3791_p1 = scmp.lt.s32.totalorder %s3789_s18, %s3783_s19 }
 0x4f6   : > { %3567 = vmatpush3.bf16.msra.mxu0 %v3564_v35  ;;  %v1639_v41 = vmul.f32 %v3776_v40, %v4293_v58 }
 0x4f7   : > { %3410 = vmatprep.subr.mxu0 %v2165_v44  ;;  %p3785_p12 = pnand %p3784_p11, %p3957_p5  ;;  %p3792_p2 = por %p3791_p1, %p3790_p0 }
 0x4f8   : > { %3400 = vmatprep.mubr.msk.f32.mxu0 %vm1510_vm5, %v1639_v41 }
 0x4f9   : > { %3401 = vmatmul.mubr.msk.f32.vlgmr.msra.gmra.mrb[20].mxu0 %vm1510_vm5, %v1640_v42  ;;  %p3786_p13 = pneg %p3785_p12 }
 0x4fa   : > { %3411 = vmatpush3.msra.mxu0 %v2165_v44 }
 0x4fb   : > { %3420 = vmatprep.subr.mxu0 %v2167_v47  ;;  %p3793_p3 = pnand %p3792_p2, %p3786_p13 }
 0x594   : > { %v3374_v48 = vpop.f32.mrb[16].mxu0 }
 0x595   : > { %v1721_v43 = vpop.f32.mrb[17].mxu0 }
 0x596   : > { %3412 = vmatprep.mubr.msk.f32.mxu0 %vm965_vm1, %v1721_v43 }
 0x597   : > { %3413 = vmatmul.mubr.msk.f32.vlgmr.msra.gmra.mrb[22].mxu0 %vm965_vm1, %v3374_v48 }
 0x598   : > { %3421 = vmatpush3.msra.mxu0 %v2167_v47 }
 0x599   : > { %3430 = vmatprep.subr.mxu0 %v2169_v49 }
 0x5b8   : > { %v3381_v50 = vpop.f32.mrb[8].mxu1 }
 0x5b9   : > { %v1808_v51 = vpop.f32.mrb[9].mxu1 }
 0x5ba   : > { %3417 = vmatprep.mubr.msk.f32.mxu1 %vm965_vm1, %v1808_v51  ;;  %v2735_v51 = vld [vmem:[%s4591_s4 + $0x8] sm:$0xff] }
 0x5bb   : > { %3418 = vmatmul.mubr.msk.f32.vlgmr.msra.gmra.mrb[14].mxu1 %vm965_vm1, %v3381_v50 }
 0x5bc   : > { %v3395_v34 = vpop.f32.mrb[10].mxu1  ;;  %3426 = vmatpush3.msra.mxu1 %v2168_v46 }
 0x5bd   : > { %v1982_v25 = vpop.f32.mrb[11].mxu1  ;;  %3435 = vmatprep.subr.mxu1 %v2170_v52 }
 0x5be   : > { %3427 = vmatprep.mubr.msk.f32.mxu1 %vm965_vm1, %v1982_v25  ;;  %v2734_v25 = vld [vmem:[%s4591_s4] sm:$0xff] }
 0x5bf   : > { %3428 = vmatmul.mubr.msk.f32.vlgmr.msra.gmra.mrb[16].mxu1 %vm965_vm1, %v3395_v34 }
 0x5c0   : > { %3436 = vmatpush3.msra.mxu1 %v2170_v52  ;;  %v2737_v52 = vld [vmem:[%s4591_s4 + $0x18] sm:$0xff] }
 0x5c1   : > { %v3572_v34 = vpack.c.bf16 %v2737_v52, %v2735_v51  ;;  %v3109_v51 = vld [vmem:[%s4598_s11] ss:$0 sm:$0xff] }
 0x5c4   : > { %v3409_v24 = vpop.f32.mrb[12].mxu1 }
 0x5c5   : > { %v2156_v54 = vpop.f32.mrb[13].mxu1 }
 0x5c6   : > { %3437 = vmatprep.mubr.msk.f32.mxu1 %vm965_vm1, %v2156_v54 }
 0x5c7   : > { %3438 = vmatmul.mubr.msk.f32.vlgmr.msra.gmra.mrb[18].mxu1 %vm965_vm1, %v3409_v24  ;;  %v2736_v24 = vld [vmem:[%s4591_s4 + $0x10] sm:$0xff] }
 0x5c8   : > { %v3388_v55 = vpop.f32.mrb[18].mxu0  ;;  %v3574_v54 = vpack.c.bf16 %v2736_v24, %v2734_v25 }
 0x5c9   : > { %v1895_v56 = vpop.f32.mrb[19].mxu0 }
 0x5ca   : > { %3422 = vmatprep.mubr.msk.f32.mxu0 %vm965_vm1, %v1895_v56  ;;  %v2741_v56 = vld [vmem:[%s4591_s4 + $0x38] sm:$0xff] }
 0x5cb   : > { %3423 = vmatmul.mubr.msk.f32.vlgmr.msra.gmra.mrb[24].mxu0 %vm965_vm1, %v3388_v55  ;;  %v2739_v55 = vld [vmem:[%s4591_s4 + $0x28] sm:$0xff] }
 0x5cc   : > { %3431 = vmatpush3.msra.mxu0 %v2169_v49  ;;  %v3402_v57 = vpop.f32.mrb[20].mxu0 }
 0x5cd   : > { %v2069_v58 = vpop.f32.mrb[21].mxu0  ;;  %3573 = vmatprep.subr.bf16.mxu0 %v3572_v34 }
 0x5ce   : > { %3432 = vmatprep.mubr.msk.f32.mxu0 %vm965_vm1, %v2069_v58  ;;  %v2738_v58 = vld [vmem:[%s4591_s4 + $0x20] sm:$0xff] }
 0x5cf   : > { %3433 = vmatmul.mubr.msk.f32.vlgmr.msra.gmra.mrb[26].mxu0 %vm965_vm1, %v3402_v57  ;;  %v3576_v57 = vpack.c.bf16 %v2741_v56, %v2739_v55  ;;  %v2866_v56 = vld [vmem:[%s4593_s6 + $0xa8] sm:$0xff] }
 0x5d0   : > { %3575 = vmatpush1.bf16.msra.mxu0 %v3574_v54 }
 0x5d1   : > { %3577 = vmatprep.subr.bf16.mxu0 %v3576_v57 }
 0x66a   : > { %v3414_v59 = vpop.f32.mrb[22].mxu0 }
 0x66b   : > { %v2243_v60 = vpop.f32.mrb[23].mxu0  ;;  %v2668_v62 = vsel %vm414_vm0, %v3414_v59, 0.0  ;;  %v2740_v59 = vld [vmem:[%s4591_s4 + $0x30] sm:$0xff] }
 0x66c   : > { %v2657_v2 = vsel %vm414_vm0, %v2243_v60, 0.0  ;;  %v3578_v60 = vpack.c.bf16 %v2740_v59, %v2738_v58  ;;  %v2868_v58 = vld [vmem:[%s4593_s6 + $0xb8] sm:$0xff] }
 0x66e   : > { %3579 = vmatpush1.bf16.msra.mxu0 %v3578_v60  ;;  %v2750_v60 = vsub.s32 0, %v4170_v0 }
 0x68e   : > { %v3419_v61 = vpop.f32.mrb[14].mxu1 }
 0x68f   : > { %v2669_v63 = vsel %vm414_vm0, %v3419_v61, 0.0  ;;  %v2324_v1 = vpop.f32.mrb[15].mxu1  ;;  %v2743_v61 = vld [vmem:[%s4591_s4 + $0x48] sm:$0xff] }
 0x690   : > { %v2670_v3 = vadd.f32 %v2669_v63, %v2668_v62  ;;  %v2658_v31 = vsel %vm414_vm0, %v2324_v1, 0.0  ;;  %v2745_v62 = vld [vmem:[%s4591_s4 + $0x58] sm:$0xff]  ;;  %v2742_v63 = vld [vmem:[%s4591_s4 + $0x40] sm:$0xff] }
 0x691   : > { %v2659_v4 = vadd.f32 %v2658_v31, %v2657_v2  ;;  %v3580_v1 = vpack.c.bf16 %v2745_v62, %v2743_v61  ;;  %v2744_v2 = vld [vmem:[%s4591_s4 + $0x50] sm:$0xff]  ;;  %v2746_v61 = vld [vmem:[%s4592_s5] sm:$0x3]  ;;  %v2754_v62 = vsub.s32 1, %v4170_v0 }
 0x692   : > { %v3429_v37 = vpop.f32.mrb[16].mxu1  ;;  %v3582_v31 = vpack.c.bf16 %v2744_v2, %v2742_v63  ;;  %v2751_v63 = vrot.slane %v2746_v61, %v2750_v60  ;;  %v3112_v0 = vld [vmem:[%s4594_s7] ss:$0 sm:$0xff] }
 0x693   : > { %v2486_v5 = vpop.f32.mrb[17].mxu1  ;;  %v2673_v13 = vsel %vm414_vm0, %v3429_v37, 0.0  ;;  %3581 = vmatprep.subr.bf16.mxu0 %v3580_v1  ;;  %v2846_v37 = vld [vmem:[%s4593_s6 + $0x8] sm:$0xff]  ;;  %v2755_v1 = vrot.slane %v2746_v61, %v2754_v62 }
 0x694   : > { %v2662_v15 = vsel %vm414_vm0, %v2486_v5, 0.0  ;;  %3583 = vmatpush1.bf16.msra.mxu0 %v3582_v31  ;;  %v2847_v5 = vld [vmem:[%s4593_s6 + $0x10] sm:$0xff] }
 0x69a   : > { %v3439_v6 = vpop.f32.mrb[18].mxu1 }
 0x69b   : > { %v2648_v7 = vpop.f32.mrb[19].mxu1  ;;  %v2677_v22 = vsel %vm414_vm0, %v3439_v6, 0.0  ;;  %v3850_v6 = vmov 0.0|0.0  }
 0x69c   : > { %v2666_v27 = vsel %vm414_vm0, %v2648_v7, 0.0  ;;  %3584 = vmatprep.subr.bf16.mxu1 %v3850_v6 }
 0x69e   : > { %v3424_v9 = vpop.f32.mrb[24].mxu0 }
 0x69f   : > { %v2671_v30 = vsel %vm414_vm0, %v3424_v9, 0.0  ;;  %v2405_v10 = vpop.f32.mrb[25].mxu0  ;;  %v2848_v9 = vld [vmem:[%s4593_s6 + $0x18] sm:$0xff] }
 0x6a0   : > { %v2672_v53 = vadd.f32 %v2671_v30, %v2670_v3  ;;  %v2660_v11 = vsel %vm414_vm0, %v2405_v10, 0.0  ;;  %v3849_v3 = vmov 0.0   ;;  %v3588_v30 = vpack.c.bf16 %v2848_v9, %v2847_v5  ;;  %v2849_v10 = vld [vmem:[%s4593_s6 + $0x20] sm:$0xff] }
 0x6a1   : > { %v2661_v14 = vadd.f32 %v2660_v11, %v2659_v4  ;;  %2828 = vmatprep.mubr.f32.mxu0 %v3849_v3  ;;  %v2845_v4 = vld [vmem:[%s4593_s6] sm:$0xff] }
 0x6a2   : > { %v3434_v16 = vpop.f32.mrb[26].mxu0  ;;  %v2674_v17 = vadd.f32 %v2673_v13, %v2672_v53  ;;  %v3585_v7 = vpack.c.bf16 %v2846_v37, %v2845_v4  ;;  %v2850_v53 = vld [vmem:[%s4593_s6 + $0x28] sm:$0xff]  ;;  %v2851_v13 = vld [vmem:[%s4593_s6 + $0x30] sm:$0xff] }
 0x6a3   : > { %v2675_v18 = vsel %vm414_vm0, %v3434_v16, 0.0  ;;  %v2567_v19 = vpop.f32.mrb[27].mxu0  ;;  %v2663_v20 = vadd.f32 %v2662_v15, %v2661_v14  ;;  %v3591_v11 = vpack.c.bf16 %v2850_v53, %v2849_v10  ;;  %v2852_v14 = vld [vmem:[%s4593_s6 + $0x38] sm:$0xff]  ;;  %v2853_v16 = vld [vmem:[%s4593_s6 + $0x40] sm:$0xff] }
 0x6a4   : > { %v2676_v21 = vadd.f32 %v2675_v18, %v2674_v17  ;;  %v2664_v12 = vsel %vm414_vm0, %v2567_v19, 0.0  ;;  %3586 = vmatpush1.bf16.msra.mxu1 %v3585_v7  ;;  %v3594_v15 = vpack.c.bf16 %v2852_v14, %v2851_v13  ;;  %v2854_v17 = vld [vmem:[%s4593_s6 + $0x48] sm:$0xff]  ;;  %v2855_v19 = vld [vmem:[%s4593_s6 + $0x50] sm:$0xff] }
 0x6a5   : > { %v2665_v26 = vadd.f32 %v2664_v12, %v2663_v20  ;;  %3587 = vmatprep.subr.bf16.mxu1 %v3850_v6  ;;  %v3597_v18 = vpack.c.bf16 %v2854_v17, %v2853_v16  ;;  %v2856_v20 = vld [vmem:[%s4593_s6 + $0x58] sm:$0xff]  ;;  %v2857_v12 = vld [vmem:[%s4593_s6 + $0x60] sm:$0xff] }
 0x6a6   : > { %v2678_v28 = vadd.f32 %v2677_v22, %v2676_v21  ;;  %v3600_v21 = vpack.c.bf16 %v2856_v20, %v2855_v19  ;;  %v2858_v22 = vld [vmem:[%s4593_s6 + $0x68] sm:$0xff] }
 0x6a7   : > { %v2667_v29 = vadd.f32 %v2666_v27, %v2665_v26  ;;  %v2859_v26 = vld [vmem:[%s4593_s6 + $0x70] sm:$0xff]  ;;  %v2860_v27 = vld [vmem:[%s4593_s6 + $0x78] sm:$0xff] }
 0x6a8   : > { %v2687_v32 = vadd.f32 %v3107_v23, %v2678_v28  ;;  %3589 = vmatpush1.bf16.msra.mxu1 %v3588_v30  ;;  %v3606_v28 = vpack.c.bf16 %v2860_v27, %v2859_v26 }
 0x6a9   : > { %v2686_v33 = vadd.f32 %v3107_v23, %v2667_v29  ;;  %3590 = vmatprep.subr.bf16.mxu1 %v3850_v6  ;;  %v3603_v23 = vpack.c.bf16 %v2858_v22, %v2857_v12  ;;  %v2861_v29 = vld [vmem:[%s4593_s6 + $0x80] sm:$0xff] }
 0x6aa   : > { %v4372_v35 = vadd.f32 %v3781_v8, %v2687_v32  ;;  %v2862_v32 = vld [vmem:[%s4593_s6 + $0x88] sm:$0xff]  ;;  %v2863_v8 = vld [vmem:[%s4593_s6 + $0x90] sm:$0xff] }
 0x6ab   : > { %v4375_v38 = vadd.f32 %v3782_v36, %v2686_v33  ;;  %v3609_v33 = vpack.c.bf16 %v2862_v32, %v2861_v29  ;;  %v2864_v36 = vld [vmem:[%s4593_s6 + $0x98] sm:$0xff] }
 0x6ac   : > { %v2693_v39 = vsel %vm414_vm0, %v4372_v35, 0.0  ;;  %3592 = vmatpush1.bf16.msra.mxu1 %v3591_v11 }
 0x6ad   : > { %2694 = vadd.xlane.f32.xlu1 %v2693_v39  ;;  %v2690_v40 = vsel %vm414_vm0, %v4375_v38, 0.0  ;;  %3593 = vmatprep.subr.bf16.mxu1 %v3850_v6  ;;  %v3612_v39 = vpack.c.bf16 %v2864_v36, %v2863_v8 }
 0x6ae   : > { %2691 = vadd.xlane.f32.xlu0 %v2690_v40 }
 0x6b0   : > { %3595 = vmatpush1.bf16.msra.mxu1 %v3594_v15 }
 0x6b1   : > { %3596 = vmatprep.subr.bf16.mxu1 %v3850_v6 }
 0x6b4   : > { %3598 = vmatpush1.bf16.msra.mxu1 %v3597_v18 }
 0x6b5   : > { %3599 = vmatprep.subr.bf16.mxu1 %v3850_v6 }
 0x6b8   : > { %3601 = vmatpush1.bf16.msra.mxu1 %v3600_v21 }
 0x6b9   : > { %3602 = vmatprep.subr.bf16.mxu1 %v3850_v6 }
 0x6bc   : > { %3604 = vmatpush1.bf16.msra.mxu1 %v3603_v23 }
 0x6bd   : > { %3605 = vmatprep.subr.bf16.mxu1 %v3850_v6 }
 0x6c0   : > { %3607 = vmatpush1.bf16.msra.mxu1 %v3606_v28 }
 0x6c1   : > { %3608 = vmatprep.subr.bf16.mxu1 %v3850_v6 }
 0x6c4   : > { %3610 = vmatpush1.bf16.msra.mxu1 %v3609_v33 }
 0x6c5   : > { %3611 = vmatprep.subr.bf16.mxu1 %v3850_v6 }
 0x6c8   : > { %3613 = vmatpush1.bf16.msra.mxu1 %v3612_v39 }
 0x6c9   : > { %3614 = vmatprep.subr.bf16.mxu1 %v3850_v6 }
 0x73a   : > { %v2695_v41 = vpop.xlane.xlu1 %2694 }
 0x73b   : > { %v2697_v42 = vmul.f32 0.020833334, %v2695_v41  ;;  %v2692_v44 = vpop.xlane.xlu0 %2691 }
 0x73c   : > { %v2696_v45 = vmul.f32 0.020833334, %v2692_v44 }
 0x73d   : > { %v4382_v46 = vsub.f32 %v4372_v35, %v2697_v42 }
 0x73e   : > { %v4385_v47 = vsub.f32 %v4375_v38, %v2696_v45 }
 0x73f   : > { %v2701_v49 = vmul.f32 %v4382_v46, %v4382_v46 }
 0x740   : > { %v2700_v48 = vmul.f32 %v4385_v47, %v4385_v47 }
 0x741   : > { %v2705_v50 = vsel %vm414_vm0, %v2701_v49, 0.0  ;;  %v3108_v49 = vld [vmem:[%s4597_s10] ss:$0 sm:$0xff] }
 0x742   : > { %v2702_v43 = vsel %vm414_vm0, %v2700_v48, 0.0 }
 0x743   : > { %2703 = vadd.xlane.f32.xlu0 %v2702_v43 }
 0x747   : > { %2706 = vadd.xlane.f32.xlu0 %v2705_v50 }
 0x7d0   : > { %v2704_v40 = vpop.xlane.xlu0 %2703 }
 0x7d1   : > { %v2708_v41 = vmul.f32 0.020833334, %v2704_v40 }
 0x7d3   : > { %v2710_v42 = vadd.f32 1e-05, %v2708_v41 }
 0x7d4   : > { %v2707_v44 = vpop.xlane.xlu0 %2706 }
 0x7d5   : > { %3777 = vrsqrt.f32 %v2710_v42  ;;  %v2709_v45 = vmul.f32 0.020833334, %v2707_v44 }
 0x7d7   : > { %v2711_v48 = vadd.f32 1e-05, %v2709_v45 }
 0x7d9   : > { %3779 = vrsqrt.f32 %v2711_v48 }
 0x7df   : > { %v3778_v43 = vpop.eup %3777 }
 0x7e0   : > { %v2714_v50 = vmul.f32 %v3778_v43, %v4385_v47  ;;  %v2865_v47 = vld [vmem:[%s4593_s6 + $0xa0] sm:$0xff] }
 0x7e1   : > { %v3615_v57 = vpack.c.bf16 %v2866_v56, %v2865_v47 }
 0x7e2   : > { %v2723_v52 = vmul.f32 %v3108_v49, %v2714_v50 }
 0x7e3   : > { %v3780_v34 = vpop.eup %3779  ;;  %3616 = vmatpush1.bf16.msra.mxu1 %v3615_v57 }
 0x7e4   : > { %v2732_v25 = vadd.f32 %v3109_v51, %v2723_v52  ;;  %v2715_v24 = vmul.f32 %v3780_v34, %v4382_v46  ;;  %3617 = vmatprep.subr.bf16.mxu1 %v3850_v6  ;;  %v2867_v46 = vld [vmem:[%s4593_s6 + $0xb0] sm:$0xff] }
 0x7e5   : > { %v3618_v59 = vpack.c.bf16 %v2868_v58, %v2867_v46 }
 0x7e6   : > { %3110 = vmatmul.mubr.msk.f32.vlgmr.msra.gmra.mrb[28].mxu0 %vm414_vm0, %v2732_v25  ;;  %v2724_v54 = vmul.f32 %v3108_v49, %v2715_v24 }
 0x7e7   : > { %2834 = vmatprep.mubr.f32.mxu0 %v3849_v3  ;;  %3619 = vmatpush1.bf16.msra.mxu1 %v3618_v59 }
 0x7e8   : > { %v2733_v55 = vadd.f32 %v3109_v51, %v2724_v54 }
 0x7ea   : > { %3111 = vmatmul.mubr.msk.f32.gmra.mrb[30].mxu0 %vm414_vm0, %v2733_v55 }
 0x8b9   : > { %v2830_v2 = vpop.f32.mrb[28].mxu0 }
 0x8ba   : > { %v2831_v3 = vadd.f32 %v2830_v2, %v2751_v63  ;;  %v2832_v31 = vpop.f32.mrb[29].mxu0 }
 0x8bb   : > { %v2833_v4 = vadd.f32 %v2832_v31, %v2755_v1 }
 0x8bc   : > { %v2841_v6 = vmax.f32 %v2831_v3, 0.0 }
 0x8bd   : > { %v2842_v37 = vmax.f32 %v2833_v4, 0.0  ;;  %v2836_v5 = vpop.f32.mrb[30].mxu0 }
 0x8be   : > { %v2837_v7 = vadd.f32 %v2836_v5, %v2751_v63  ;;  %v2838_v9 = vpop.f32.mrb[31].mxu0 }
 0x8bf   : > { %v2839_v30 = vadd.f32 %v2838_v9, %v2755_v1  ;;  %3113 = vmatprep.mubr.msk.f32.mxu1 %vm2876_vm6, %v2842_v37 }
 0x8c0   : > { %2948 = vmatmul.mubr.f32.vlgmr.msra.gmra.mrb[20].mxu1 %v2841_v6  ;;  %v2843_v53 = vmax.f32 %v2837_v7, 0.0 }
 0x8c1   : > { %v2844_v10 = vmax.f32 %v2839_v30, 0.0 }
 0x8c3   : > { %3114 = vmatprep.mubr.msk.f32.mxu1 %vm2876_vm6, %v2844_v10 }
 0x8c4   : > { %2953 = vmatmul.mubr.f32.gmra.mrb[22].mxu1 %v2843_v53 }
 0x993   : > { %v2949_v11 = vpop.f32.mrb[20].mxu1 }
 0x994   : > { %v2950_v13 = vadd.f32 %v3112_v0, %v2949_v11  ;;  %v2951_v14 = vpop.f32.mrb[21].mxu1 }
 0x996   : > { %v2958_v15 = vadd.f32 %v2950_v13, %v4375_v38 }
 0x997   : > { %v2954_v16 = vpop.f32.mrb[22].mxu1 }
 0x998   : > { %2960 = vst.msk [vmem:[%s406_s20] sm:$0xff] %vm414_vm0, %v2958_v15  ;;  %v2955_v17 = vadd.f32 %v3112_v0, %v2954_v16  ;;  %v2956_v18 = vpop.f32.mrb[23].mxu1 }
 0x99a   : > { %v2959_v38 = vadd.f32 %v2955_v17, %v4372_v35 }
 0x99c   : > { %2961 = vst.msk [vmem:[%s406_s20 + $0x8] sm:$0xff] %vm414_vm0, %v2959_v38 }
 0x99d   : > { %3796 = shalt.err (!%p3793_p3)
}
 0x99e   : > { %s3797_s8 = scalar_lea.hbm %s4540_s16, 256  ;;  %s3801_s29 = scalar_lea.hbm %s4599_s12, 512 }
 0x99f   : > { %p3798_p4 = scmp.ne.s32.totalorder %s4540_s16, %s3797_s8  ;;  %p3802_p9 = scmp.lt.u32.totalorder %s4540_s16, %s4599_s12 }
 0x9a0   : > { %p3803_p10 = scmp.lt.u32.totalorder %s3801_s29, %s3797_s8  ;;  %p3805_p12 = scmp.lt.u32.totalorder %s3797_s8, %s4540_s16 }
 0x9a1   : > { %p3799_p7 = pnand %p3798_p4, %p3957_p5 }
 0x9a2   : > { %p3804_p11 = por %p3803_p10, %p3802_p9 }
 0x9a3   : > { %p3800_p8 = pneg %p3799_p7 }
 0x9a4   : > { %p3806_p13 = por %p3805_p12, %p3804_p11 }
 0x9a6   : > { %p3807_p0 = pnand %p3806_p13, %p3800_p8 }
 0x9a8   : > { %3810 = shalt.err (!%p3807_p0)
}
 0x9a9   : > { %s3852_s19 = smov 128   ;;  %s3853_s0 = smov 8  }
 0x9aa   : > { %3620 = dma.vmem_to_hbm [thread:$0]  (%p3957_p5), %s4542_s26, 256, %s4540_s16, %s4546_s25, %s3852_s19, %s3852_s19, %s3853_s0  }
 0x9ab PF: > { %p3626_p1 = scmp.ge.s32.totalorder %s3845_s24, 2  ;;  %s2991_s18 = sand.u32 1, %s3833_s21  }
 0x9ac   : > { %s2992_s8 = scalar_lea.sflag [#allocation3], %s2991_s18 }
 0x9ad   : > { %p3623_p2 = pnand %p3626_p1, %p3961_p6 }
 0x9af   : > { %3828 = dma.done.wait (!%p3623_p2), %s2992_s8, 256  }
 0x9b0   : > { %3830 = vsyncadd (!%p3623_p2), %s2992_s8, 4294967040  ;;  %p22_p3 = scmp.ge.s32.totalorder %s3944_s27, 4   ;;  %s4612_s21 = smov %s3837_s22 }
 0x9b1   : > { %s4613_s22 = smov %s3841_s23  ;;  %s4614_s23 = smov %s3955_s30 }
 0x9b2   : > { %s4615_s24 = smov %s3944_s27  ;;  %24 = sbr.rel (!%p22_p3) target bundleno = 6 (0x6), region = 103 }
 0x9b9   :  { %2997 = vsyncpa [#allocation3], 1 }
 0x9ba   :  { %2999 = vsyncpa [#allocation3 + $0x1], 1 }

</bundles_post_ra>
